<compile_context>
chip_gen: v6e
topology: v6e:2x2x1
jax: 0.10.0
libtpu: 0.0.40
codegen_flags: <defaults>
</compile_context>

<pallas_src>
import functools

import jax
import jax.numpy as jnp
from jax.experimental import pallas as pl
from jax.experimental.pallas import tpu as pltpu

FEAT_DIM = 512     # backbone feature dim / projection input_dim
HID_DIM = 512      # projection hidden_dim
OUT_DIM = 128      # projection output_dim
KSIZE = 3
BN_EPS = 1e-5
LANE = 128


# ---------------------------------------------------------------------------
# Fused kernel. Grid = (B // BT, HW // HW_TILE), both axes "arbitrary".
#   per step : conv-as-GEMM (bf16 MXU) + bias + ReLU on a (BT*HW_TILE, KKC_pad)
#              patch slab, per-image pooled partial sums accumulated into a
#              persistent VMEM scratch feat_acc[B, 512].
#   last step: global-avg-pool finalize (1/HW) + SimCLR projection head
#              (Linear -> BN batch-stats -> ReLU -> Linear) -> z[B, 128].
# ---------------------------------------------------------------------------
def _fused_kernel(p_ref, cw_ref, cb_ref, w1_ref, g_ref, beta_ref, w2_ref, b2_ref,
                  z_ref, feat_acc, *, bt, hw_tile, hw_total):
    b = pl.program_id(0)
    t = pl.program_id(1)

    @pl.when(jnp.logical_and(b == 0, t == 0))
    def _init():
        feat_acc[...] = jnp.zeros_like(feat_acc)

    # conv-as-GEMM on the MXU: bf16 operands, f32 accumulation.
    kkc = p_ref.shape[-1]
    p = p_ref[...].reshape(bt * hw_tile, kkc)                       # bf16
    y = jnp.dot(p, cw_ref[...], preferred_element_type=jnp.float32)  # (bt*hw_tile, 512) f32
    y = jnp.maximum(y + cb_ref[...], 0.0)                           # bias + ReLU (f32, VPU)

    # per-image pooled partial sum over this HW tile (ReLU before sum, as in the module)
    partial = jnp.sum(y.reshape(bt, hw_tile, FEAT_DIM), axis=1)     # (bt, 512) f32
    feat_acc[pl.ds(b * bt, bt), :] += partial

    # projection-head epilogue once all features are accumulated
    @pl.when(jnp.logical_and(b == pl.num_programs(0) - 1,
                             t == pl.num_programs(1) - 1))
    def _epilogue():
        f = feat_acc[...] * (1.0 / hw_total)                        # global average pool (true HW)
        # Linear(512, 512, bias=False)
        h = jnp.dot(f.astype(jnp.bfloat16), w1_ref[...],
                    preferred_element_type=jnp.float32)             # (B, 512) f32
        # BatchNorm1d with training-mode batch statistics (biased variance), f32 on VPU
        mu = jnp.mean(h, axis=0, keepdims=True)
        c = h - mu                                                  # reuse centered tensor
        var = jnp.mean(c * c, axis=0, keepdims=True)
        hn = c * jax.lax.rsqrt(var + BN_EPS)                        # EUP rsqrt
        hn = hn * g_ref[...] + beta_ref[...]
        hn = jnp.maximum(hn, 0.0)                                   # ReLU
        # Linear(512, 128, bias=True)
        z = jnp.dot(hn.astype(jnp.bfloat16), w2_ref[...],
                    preferred_element_type=jnp.float32)
        z_ref[...] = z + b2_ref[...]


# ---------------------------------------------------------------------------
# Wrapper glue (plain JAX): NCHW -> NHWC, im2col, lane padding, tiling choice.
# ---------------------------------------------------------------------------
def _im2col_3x3(x_nhwc):
    """x: [B, H, W, C] -> patches [B, H*W, 9*C] (same padding, stride 1, (ky,kx,c) order)."""
    B, H, W, C = x_nhwc.shape
    xp = jnp.pad(x_nhwc, ((0, 0), (1, 1), (1, 1), (0, 0)))
    slabs = [xp[:, dy:dy + H, dx:dx + W, :]
             for dy in range(KSIZE) for dx in range(KSIZE)]
    patches = jnp.concatenate(slabs, axis=-1)                       # [B, H, W, 9*C]
    return patches.reshape(B, H * W, KSIZE * KSIZE * C)


def _pick_hw_tile(hw, cap=2048):
    """Largest divisor of HW that is <= cap and a multiple of 8 (or HW itself)."""
    if hw <= cap:
        return hw
    for d in range(cap, 7, -1):
        if hw % d == 0 and d % 8 == 0:
            return d
    return hw


def _pick_batch_tile(b, bytes_per_img, budget=4 * 1024 * 1024):
    cap = max(1, budget // max(bytes_per_img, 1))
    for d in range(min(b, cap), 0, -1):
        if b % d == 0:
            return d
    return 1


def simclr_forward(x_nchw, params):
    """Full SimCLR forward. x: [B, C, H, W] float32 -> z: [B, 128] float32."""
    B, C, H, W = x_nchw.shape
    HW = H * W
    x_nhwc = jnp.transpose(x_nchw, (0, 2, 3, 1))                    # NCHW -> NHWC
    patches = _im2col_3x3(x_nhwc)                                   # [B, HW, 9C] f32
    KKC = patches.shape[-1]
    kkc_pad = ((KKC + LANE - 1) // LANE) * LANE                     # pad contraction to 128 lanes

    # zero-pad contraction dim on both operands (numerically exact), emit bf16 for the MXU
    patches = jnp.pad(patches, ((0, 0), (0, 0), (0, kkc_pad - KKC))).astype(jnp.bfloat16)
    conv_w = jnp.pad(params["conv_w"], ((0, kkc_pad - KKC), (0, 0))).astype(jnp.bfloat16)
    w1 = params["w1"].astype(jnp.bfloat16)
    w2 = params["w2"].astype(jnp.bfloat16)

    hw_tile = _pick_hw_tile(HW)
    bt = _pick_batch_tile(B, hw_tile * kkc_pad * 2)
    grid = (B // bt, HW // hw_tile)

    kernel = functools.partial(_fused_kernel, bt=bt, hw_tile=hw_tile, hw_total=HW)

    z = pl.pallas_call(
        kernel,
        out_shape=jax.ShapeDtypeStruct((B, OUT_DIM), jnp.float32),
        grid_spec=pltpu.PrefetchScalarGridSpec(
            num_scalar_prefetch=0,
            grid=grid,
            in_specs=[
                pl.BlockSpec((bt, hw_tile, kkc_pad), lambda b, t: (b, t, 0)),   # patches
                pl.BlockSpec((kkc_pad, FEAT_DIM), lambda b, t: (0, 0)),         # conv_w (bf16)
                pl.BlockSpec((1, FEAT_DIM), lambda b, t: (0, 0)),               # conv_b (f32)
                pl.BlockSpec((FEAT_DIM, HID_DIM), lambda b, t: (0, 0)),         # w1 (bf16)
                pl.BlockSpec((1, HID_DIM), lambda b, t: (0, 0)),                # bn_gamma
                pl.BlockSpec((1, HID_DIM), lambda b, t: (0, 0)),                # bn_beta
                pl.BlockSpec((HID_DIM, OUT_DIM), lambda b, t: (0, 0)),          # w2 (bf16)
                pl.BlockSpec((1, OUT_DIM), lambda b, t: (0, 0)),                # b2
            ],
            out_specs=pl.BlockSpec((B, OUT_DIM), lambda b, t: (0, 0)),
            scratch_shapes=[pltpu.VMEM((B, FEAT_DIM), jnp.float32)],            # feature accumulator
        ),
        compiler_params=pltpu.CompilerParams(
            dimension_semantics=("arbitrary", "arbitrary"),
            vmem_limit_bytes=48 * 1024 * 1024,   # headroom below v7x's 64 MiB VMEM
        ),
    )(patches, conv_w, params["conv_b"], w1, params["bn_gamma"], params["bn_beta"],
      w2, params["b2"])
    return z


def make_params(key, c_in):
    """Deterministic synthetic parameters (shapes from the module's __init__)."""
    k = jax.random.split(key, 5)
    kkc = KSIZE * KSIZE * c_in
    return {
        # conv weight stored as [ky*kx*c, out] to match the im2col (ky,kx,c) ordering
        # (a PyTorch [out,in,kh,kw] weight would be transposed to [kh,kw,in,out] first).
        "conv_w": (0.05 * jax.random.normal(k[0], (kkc, FEAT_DIM))).astype(jnp.float32),
        "conv_b": (0.05 * jax.random.normal(k[1], (1, FEAT_DIM))).astype(jnp.float32),
        # projection head: Linear(512,512,bias=False) [BN follows] -> Linear(512,128,bias=True)
        "w1": (0.05 * jax.random.normal(k[2], (FEAT_DIM, HID_DIM))).astype(jnp.float32),
        "bn_gamma": jnp.ones((1, HID_DIM), jnp.float32),
        "bn_beta": jnp.zeros((1, HID_DIM), jnp.float32),
        "w2": (0.05 * jax.random.normal(k[3], (HID_DIM, OUT_DIM))).astype(jnp.float32),
        "b2": (0.05 * jax.random.normal(k[4], (1, OUT_DIM))).astype(jnp.float32),
    }


if __name__ == "__main__":
    key = jax.random.PRNGKey(0)
    kx, kp = jax.random.split(key)

    B, C, H, W = 2, 4, 16, 16                                       # small NCHW input
    x = jax.random.normal(kx, (B, C, H, W), dtype=jnp.float32)
    params = make_params(kp, C)

    z = simclr_forward(x, params)
    z = jax.block_until_ready(z)
    assert z.shape == (B, OUT_DIM) and z.dtype == jnp.float32
    assert bool(jnp.all(jnp.isfinite(z)))
    print("KERNEL_OK")
</pallas_src>

<mosaic_0001>
module attributes {stable_mosaic.version = 11 : i64} {
  func.func @_fused_kernel(%arg0: i32, %arg1: i32, %arg2: memref<2x256x128xbf16, #tpu.memory_space<vmem>>, %arg3: memref<128x512xbf16, #tpu.memory_space<vmem>>, %arg4: memref<1x512xf32, #tpu.memory_space<vmem>>, %arg5: memref<512x512xbf16, #tpu.memory_space<vmem>>, %arg6: memref<1x512xf32, #tpu.memory_space<vmem>>, %arg7: memref<1x512xf32, #tpu.memory_space<vmem>>, %arg8: memref<512x128xbf16, #tpu.memory_space<vmem>>, %arg9: memref<1x128xf32, #tpu.memory_space<vmem>>, %arg10: memref<2x128xf32, #tpu.memory_space<vmem>>, %arg11: memref<2x512xf32, #tpu.memory_space<vmem>>) attributes {dimension_semantics = [#tpu.dimension_semantics<arbitrary>, #tpu.dimension_semantics<arbitrary>], iteration_bounds = array<i64: 1, 1>, scalar_prefetch = 0 : i64, scratch_operands = 1 : i64, tpu.core_type = #tpu.core_type<tc>, window_params = [{transform_indices = @transform_0, window_bounds = array<i64: 2, 256, 128>}, {pipeline_mode = #tpu.pipeline_mode<synchronous>, transform_indices = @transform_1, window_bounds = array<i64: 128, 512>}, {pipeline_mode = #tpu.pipeline_mode<synchronous>, transform_indices = @transform_2, window_bounds = array<i64: 1, 512>}, {pipeline_mode = #tpu.pipeline_mode<synchronous>, transform_indices = @transform_3, window_bounds = array<i64: 512, 512>}, {pipeline_mode = #tpu.pipeline_mode<synchronous>, transform_indices = @transform_4, window_bounds = array<i64: 1, 512>}, {pipeline_mode = #tpu.pipeline_mode<synchronous>, transform_indices = @transform_5, window_bounds = array<i64: 1, 512>}, {pipeline_mode = #tpu.pipeline_mode<synchronous>, transform_indices = @transform_6, window_bounds = array<i64: 512, 128>}, {pipeline_mode = #tpu.pipeline_mode<synchronous>, transform_indices = @transform_7, window_bounds = array<i64: 1, 128>}, {pipeline_mode = #tpu.pipeline_mode<synchronous>, transform_indices = @transform_8, window_bounds = array<i64: 2, 128>}]} {
    %c0_i32 = arith.constant 0 : i32
    %0 = arith.cmpi eq, %arg0, %c0_i32 : i32
    %c0_i32_0 = arith.constant 0 : i32
    %1 = arith.cmpi eq, %arg1, %c0_i32_0 : i32
    %2 = arith.andi %0, %1 : i1
    %3 = arith.extui %2 : i1 to i32
    %c0_i32_1 = arith.constant 0 : i32
    %4 = arith.cmpi ne, %3, %c0_i32_1 : i32
    scf.if %4 {
      %cst_15 = arith.constant 0.000000e+00 : f32
      %27 = vector.broadcast %cst_15 : f32 to vector<2x512xf32>
      %c0_16 = arith.constant 0 : index
      %c0_17 = arith.constant 0 : index
      %28 = vector.load %arg11[%c0_16, %c0_17] : memref<2x512xf32, #tpu.memory_space<vmem>>, vector<2x512xf32>
      tpu.vector_store %arg11[%c0_16, %c0_17], %27 {strides = array<i32>} : memref<2x512xf32, #tpu.memory_space<vmem>>, vector<2x512xf32>,
    } else {
    }
    %c0 = arith.constant 0 : index
    %c0_2 = arith.constant 0 : index
    %c0_3 = arith.constant 0 : index
    %5 = vector.load %arg2[%c0, %c0_2, %c0_3] : memref<2x256x128xbf16, #tpu.memory_space<vmem>>, vector<2x256x128xbf16>
    %6 = vector.shape_cast %5 : vector<2x256x128xbf16> to vector<512x128xbf16>
    %c0_4 = arith.constant 0 : index
    %c0_5 = arith.constant 0 : index
    %7 = vector.load %arg3[%c0_4, %c0_5] : memref<128x512xbf16, #tpu.memory_space<vmem>>, vector<128x512xbf16>
    %cst = arith.constant dense<0.000000e+00> : vector<512x512xf32>
    %8 = tpu.matmul %6, %7, %cst {dimension_numbers = #tpu.dot_dimension_numbers<[1], [0], [0], [1], [0, 0, 1, 1], [], []>} : vector<512x128xbf16>, vector<128x512xbf16>, vector<512x512xf32> -> vector<512x512xf32>
    %c0_6 = arith.constant 0 : index
    %c0_7 = arith.constant 0 : index
    %9 = vector.load %arg4[%c0_6, %c0_7] : memref<1x512xf32, #tpu.memory_space<vmem>>, vector<1x512xf32>
    %10 = vector.broadcast %9 : vector<1x512xf32> to vector<512x512xf32>
    %11 = arith.addf %8, %10 : vector<512x512xf32>
    %cst_8 = arith.constant 0.000000e+00 : f32
    %12 = vector.broadcast %cst_8 : f32 to vector<512x512xf32>
    %13 = arith.maximumf %11, %12 : vector<512x512xf32>
    %14 = vector.shape_cast %13 : vector<512x512xf32> to vector<2x256x512xf32>
    %cst_9 = arith.constant dense<0.000000e+00> : vector<2x512xf32>
    %15 = vector.multi_reduction <add>, %14, %cst_9 [1] : vector<2x256x512xf32> to vector<2x512xf32>
    %c2_i32 = arith.constant 2 : i32
    %16 = arith.muli %arg0, %c2_i32 : i32
    %17 = arith.index_cast %16 : i32 to index
    %c0_10 = arith.constant 0 : index
    %18 = vector.load %arg11[%17, %c0_10] : memref<2x512xf32, #tpu.memory_space<vmem>>, vector<2x512xf32>
    %19 = arith.addf %18, %15 : vector<2x512xf32>
    %20 = arith.index_cast %16 : i32 to index
    %c0_11 = arith.constant 0 : index
    %21 = vector.load %arg11[%20, %c0_11] : memref<2x512xf32, #tpu.memory_space<vmem>>, vector<2x512xf32>
    tpu.vector_store %arg11[%20, %c0_11], %19 {strides = array<i32>} : memref<2x512xf32, #tpu.memory_space<vmem>>, vector<2x512xf32>,
    %c0_i32_12 = arith.constant 0 : i32
    %22 = arith.cmpi eq, %arg0, %c0_i32_12 : i32
    %c0_i32_13 = arith.constant 0 : i32
    %23 = arith.cmpi eq, %arg1, %c0_i32_13 : i32
    %24 = arith.andi %22, %23 : i1
    %25 = arith.extui %24 : i1 to i32
    %c0_i32_14 = arith.constant 0 : i32
    %26 = arith.cmpi ne, %25, %c0_i32_14 : i32
    scf.if %26 {
      %c0_15 = arith.constant 0 : index
      %c0_16 = arith.constant 0 : index
      %27 = vector.load %arg11[%c0_15, %c0_16] : memref<2x512xf32, #tpu.memory_space<vmem>>, vector<2x512xf32>
      %cst_17 = arith.constant 3.906250e-03 : f32
      %28 = vector.broadcast %cst_17 : f32 to vector<2x512xf32>
      %29 = arith.mulf %27, %28 : vector<2x512xf32>
      %30 = arith.truncf %29 : vector<2x512xf32> to vector<2x512xbf16>
      %c0_18 = arith.constant 0 : index
      %c0_19 = arith.constant 0 : index
      %31 = vector.load %arg5[%c0_18, %c0_19] : memref<512x512xbf16, #tpu.memory_space<vmem>>, vector<512x512xbf16>
      %cst_20 = arith.constant dense<0.000000e+00> : vector<2x512xf32>
      %32 = tpu.matmul %30, %31, %cst_20 {dimension_numbers = #tpu.dot_dimension_numbers<[1], [0], [0], [1], [0, 0, 1, 1], [], []>} : vector<2x512xbf16>, vector<512x512xbf16>, vector<2x512xf32> -> vector<2x512xf32>
      %cst_21 = arith.constant dense<0.000000e+00> : vector<512xf32>
      %33 = vector.multi_reduction <add>, %32, %cst_21 [0] : vector<2x512xf32> to vector<512xf32>
      %34 = vector.shape_cast %33 : vector<512xf32> to vector<1x512xf32>
      %cst_22 = arith.constant 2.000000e+00 : f32
      %35 = vector.broadcast %cst_22 : f32 to vector<1x512xf32>
      %36 = arith.divf %34, %35 : vector<1x512xf32>
      %37 = vector.broadcast %36 : vector<1x512xf32> to vector<2x512xf32>
      %38 = arith.subf %32, %37 : vector<2x512xf32>
      %39 = arith.mulf %38, %38 : vector<2x512xf32>
      %cst_23 = arith.constant dense<0.000000e+00> : vector<512xf32>
      %40 = vector.multi_reduction <add>, %39, %cst_23 [0] : vector<2x512xf32> to vector<512xf32>
      %41 = vector.shape_cast %40 : vector<512xf32> to vector<1x512xf32>
      %cst_24 = arith.constant 2.000000e+00 : f32
      %42 = vector.broadcast %cst_24 : f32 to vector<1x512xf32>
      %43 = arith.divf %41, %42 : vector<1x512xf32>
      %cst_25 = arith.constant 9.99999974E-6 : f32
      %44 = vector.broadcast %cst_25 : f32 to vector<1x512xf32>
      %45 = arith.addf %43, %44 : vector<1x512xf32>
      %46 = math.rsqrt %45 : vector<1x512xf32>
      %47 = vector.broadcast %46 : vector<1x512xf32> to vector<2x512xf32>
      %48 = arith.mulf %38, %47 : vector<2x512xf32>
      %c0_26 = arith.constant 0 : index
      %c0_27 = arith.constant 0 : index
      %49 = vector.load %arg6[%c0_26, %c0_27] : memref<1x512xf32, #tpu.memory_space<vmem>>, vector<1x512xf32>
      %50 = vector.broadcast %49 : vector<1x512xf32> to vector<2x512xf32>
      %51 = arith.mulf %48, %50 : vector<2x512xf32>
      %c0_28 = arith.constant 0 : index
      %c0_29 = arith.constant 0 : index
      %52 = vector.load %arg7[%c0_28, %c0_29] : memref<1x512xf32, #tpu.memory_space<vmem>>, vector<1x512xf32>
      %53 = vector.broadcast %52 : vector<1x512xf32> to vector<2x512xf32>
      %54 = arith.addf %51, %53 : vector<2x512xf32>
      %cst_30 = arith.constant 0.000000e+00 : f32
      %55 = vector.broadcast %cst_30 : f32 to vector<2x512xf32>
      %56 = arith.maximumf %54, %55 : vector<2x512xf32>
      %57 = arith.truncf %56 : vector<2x512xf32> to vector<2x512xbf16>
      %c0_31 = arith.constant 0 : index
      %c0_32 = arith.constant 0 : index
      %58 = vector.load %arg8[%c0_31, %c0_32] : memref<512x128xbf16, #tpu.memory_space<vmem>>, vector<512x128xbf16>
      %cst_33 = arith.constant dense<0.000000e+00> : vector<2x128xf32>
      %59 = tpu.matmul %57, %58, %cst_33 {dimension_numbers = #tpu.dot_dimension_numbers<[1], [0], [0], [1], [0, 0, 1, 1], [], []>} : vector<2x512xbf16>, vector<512x128xbf16>, vector<2x128xf32> -> vector<2x128xf32>
      %c0_34 = arith.constant 0 : index
      %c0_35 = arith.constant 0 : index
      %60 = vector.load %arg9[%c0_34, %c0_35] : memref<1x128xf32, #tpu.memory_space<vmem>>, vector<1x128xf32>
      %61 = vector.broadcast %60 : vector<1x128xf32> to vector<2x128xf32>
      %62 = arith.addf %59, %61 : vector<2x128xf32>
      %c0_36 = arith.constant 0 : index
      %c0_37 = arith.constant 0 : index
      %63 = vector.load %arg10[%c0_36, %c0_37] : memref<2x128xf32, #tpu.memory_space<vmem>>, vector<2x128xf32>
      tpu.vector_store %arg10[%c0_36, %c0_37], %62 {strides = array<i32>} : memref<2x128xf32, #tpu.memory_space<vmem>>, vector<2x128xf32>,
    } else {
    }
    return
  }
  func.func @transform_0(%arg0: i32, %arg1: i32) -> (i32, i32, i32) {
    %c0_i32 = arith.constant 0 : i32
    %c0_i32_0 = arith.constant 0 : i32
    return %arg0, %arg1, %c0_i32 : i32, i32, i32
  }
  func.func @transform_1(%arg0: i32, %arg1: i32) -> (i32, i32) {
    %c0_i32 = arith.constant 0 : i32
    %c0_i32_0 = arith.constant 0 : i32
    %c0_i32_1 = arith.constant 0 : i32
    return %c0_i32, %c0_i32_0 : i32, i32
  }
  func.func @transform_2(%arg0: i32, %arg1: i32) -> (i32, i32) {
    %c0_i32 = arith.constant 0 : i32
    %c0_i32_0 = arith.constant 0 : i32
    %c0_i32_1 = arith.constant 0 : i32
    return %c0_i32, %c0_i32_0 : i32, i32
  }
  func.func @transform_3(%arg0: i32, %arg1: i32) -> (i32, i32) {
    %c0_i32 = arith.constant 0 : i32
    %c0_i32_0 = arith.constant 0 : i32
    %c0_i32_1 = arith.constant 0 : i32
    return %c0_i32, %c0_i32_0 : i32, i32
  }
  func.func @transform_4(%arg0: i32, %arg1: i32) -> (i32, i32) {
    %c0_i32 = arith.constant 0 : i32
    %c0_i32_0 = arith.constant 0 : i32
    %c0_i32_1 = arith.constant 0 : i32
    return %c0_i32, %c0_i32_0 : i32, i32
  }
  func.func @transform_5(%arg0: i32, %arg1: i32) -> (i32, i32) {
    %c0_i32 = arith.constant 0 : i32
    %c0_i32_0 = arith.constant 0 : i32
    %c0_i32_1 = arith.constant 0 : i32
    return %c0_i32, %c0_i32_0 : i32, i32
  }
  func.func @transform_6(%arg0: i32, %arg1: i32) -> (i32, i32) {
    %c0_i32 = arith.constant 0 : i32
    %c0_i32_0 = arith.constant 0 : i32
    %c0_i32_1 = arith.constant 0 : i32
    return %c0_i32, %c0_i32_0 : i32, i32
  }
  func.func @transform_7(%arg0: i32, %arg1: i32) -> (i32, i32) {
    %c0_i32 = arith.constant 0 : i32
    %c0_i32_0 = arith.constant 0 : i32
    %c0_i32_1 = arith.constant 0 : i32
    return %c0_i32, %c0_i32_0 : i32, i32
  }
  func.func @transform_8(%arg0: i32, %arg1: i32) -> (i32, i32) {
    %c0_i32 = arith.constant 0 : i32
    %c0_i32_0 = arith.constant 0 : i32
    %c0_i32_1 = arith.constant 0 : i32
    return %c0_i32, %c0_i32_0 : i32, i32
  }
}

</mosaic_0001>

<bundles_post_ra>
// kernel: tpu_custom_call.1
= control target key start
LH: loop header
LB: loop body
LE: loop exit
PB: predicated region body
PF: predicated region fallthrough
CT: control target
= control target key end

     0   :  { %13 = vsyncpa [#allocation4], 0  ;;  %s4801_s0 = inlined_call_operand.hbm [shape: bf16[2,256,128], index: 0, kind: input, shape index: {}]   ;;  %s4802_s1 = inlined_call_operand.hbm [shape: bf16[128,512], index: 1, kind: input, shape index: {}]   ;;  %s4803_s2 = inlined_call_operand.hbm [shape: f32[1,512], index: 2, kind: input, shape index: {}]   ;;  %s4804_s3 = inlined_call_operand.hbm [shape: bf16[512,512], index: 3, kind: input, shape index: {}]   ;;  %s4805_s4 = inlined_call_operand.vmem [shape: f32[1,512], index: 4, kind: input, shape index: {}]   ;;  %s4806_s5 = inlined_call_operand.vmem [shape: f32[1,512], index: 5, kind: input, shape index: {}]   ;;  %s4807_s6 = inlined_call_operand.hbm [shape: bf16[512,128], index: 6, kind: input, shape index: {}]   ;;  %s4808_s7 = inlined_call_operand.vmem [shape: f32[1,128], index: 7, kind: input, shape index: {}]   ;;  %s4809_s8 = inlined_call_operand.hbm [shape: f32[2,128], index: 8, kind: output, shape index: {}]  }
   0x1   :  { %14 = vsyncpa [#allocation7], 0 }
   0x2   :  { %15 = vsyncpa [#allocation10], 0 }
   0x3   :  { %16 = vsyncpa [#allocation5], 0  ;;  %s4089_s27 = smov [#allocation6]  }
   0x4   :  { %s34_s28 = sshll.u32 %s4089_s27, 4  ;;  %s35_s28 = int_to_ptr.vmem [resolvable:$true] %s34_s28 }
   0x5   :  { %s3969_s29 = scalar_lea.vmem %s35_s28, 4096  ;;  %p3974_p1 = scmp.lt.s32.totalorder %s35_s28, %s35_s28 }
   0x6   :  { %p3970_p0 = scmp.ne.s32.totalorder %s35_s28, %s3969_s29  ;;  %p3975_p2 = scmp.lt.s32.totalorder %s3969_s29, %s3969_s29 }
   0x8   :  { %p3976_p3 = por %p3975_p2, %p3974_p1 }
   0xa   :  { %p3977_p4 = pnand %p3976_p3, %p3970_p0 }
   0xc   :  { %3980 = shalt.err (!%p3977_p4)
}
   0xd   :  { %s4090_s30 = smov 256   ;;  %s4091_s9 = smov 16  }
   0xe   :  { %40 = dma.hbm_to_vmem [thread:$0]  %s4802_s1, 4096, %s35_s28, [#allocation7], %s4090_s30, %s4090_s30, %s4091_s9  }
   0xf   :  { %s4092_s12 = smov [#allocation9]   ;;  %s4093_s14 = smov [#allocation3]  }
  0x10   :  { %s56_s13 = sshll.u32 %s4092_s12, 4  ;;  %s22_s15 = sshll.u32 %s4093_s14, 4  ;;  %s57_s13 = int_to_ptr.vmem [resolvable:$true] %s56_s13  ;;  %s23_s15 = int_to_ptr.vmem [resolvable:$true] %s22_s15 }
  0x11   :  { %s3989_s16 = scalar_lea.vmem %s57_s13, 16384  ;;  %p3994_p6 = scmp.lt.s32.totalorder %s57_s13, %s57_s13 }
  0x12   :  { %p3990_p5 = scmp.ne.s32.totalorder %s57_s13, %s3989_s16  ;;  %p3995_p7 = scmp.lt.s32.totalorder %s3989_s16, %s3989_s16 }
  0x14   :  { %p3996_p8 = por %p3995_p7, %p3994_p6 }
  0x16   :  { %p3997_p9 = pnand %p3996_p8, %p3990_p5 }
  0x18   :  { %4000 = shalt.err (!%p3997_p9)
}
  0x19   :  { %62 = dma.hbm_to_vmem [thread:$0]  %s4804_s3, 16384, %s57_s13, [#allocation10], %s4090_s30, %s4090_s30, %s4091_s9  }
  0x1a   :  { %s4009_s19 = scalar_lea.vmem %s23_s15, 4096  ;;  %p4014_p11 = scmp.lt.s32.totalorder %s23_s15, %s23_s15 }
  0x1b   :  { %p4010_p10 = scmp.ne.s32.totalorder %s23_s15, %s4009_s19  ;;  %p4015_p12 = scmp.lt.s32.totalorder %s4009_s19, %s4009_s19 }
  0x1d   :  { %p4016_p13 = por %p4015_p12, %p4014_p11 }
  0x1f   :  { %p4017_p0 = pnand %p4016_p13, %p4010_p10 }
  0x21   :  { %4020 = shalt.err (!%p4017_p0)
}
  0x22   :  { %s4094_s1 = smov 64   ;;  %s4095_s20 = smov 4  }
  0x23   :  { %28 = dma.hbm_to_vmem [thread:$0]  %s4801_s0, 4096, %s23_s15, [#allocation4], %s4094_s1, %s4094_s1, %s4095_s20  }
  0x24   :  { %s4096_s23 = smov [#allocation8]   ;;  %s4097_s25 = smov [#allocation11]  }
  0x25   :  { %s47_s24 = sshll.u32 %s4096_s23, 4  ;;  %s72_s26 = sshll.u32 %s4097_s25, 4  ;;  %s48_s24 = int_to_ptr.vmem [resolvable:$true] %s47_s24  ;;  %s73_s26 = int_to_ptr.vmem [resolvable:$true] %s72_s26 }
  0x26   :  { %s4029_s3 = scalar_lea.vmem %s48_s24, 64  ;;  %p4034_p2 = scmp.lt.s32.totalorder %s48_s24, %s48_s24 }
  0x27   :  { %p4030_p1 = scmp.ne.s32.totalorder %s48_s24, %s4029_s3  ;;  %p4035_p3 = scmp.lt.s32.totalorder %s4029_s3, %s4029_s3 }
  0x29   :  { %p4036_p4 = por %p4035_p3, %p4034_p2 }
  0x2b   :  { %p4037_p5 = pnand %p4036_p4, %p4030_p1 }
  0x2d   :  { %4040 = shalt.err (!%p4037_p5)
}
  0x2e   :  { %50 = dma.hbm_to_vmem [thread:$0]  %s4803_s2, 64, %s48_s24, [#allocation7]  }
  0x2f   :  { %s4049_s29 = scalar_lea.vmem %s73_s26, 4096  ;;  %p4054_p7 = scmp.lt.s32.totalorder %s73_s26, %s73_s26 }
  0x30   :  { %p4050_p6 = scmp.ne.s32.totalorder %s73_s26, %s4049_s29  ;;  %p4055_p8 = scmp.lt.s32.totalorder %s4049_s29, %s4049_s29 }
  0x32   :  { %p4056_p9 = por %p4055_p8, %p4054_p7 }
  0x34   :  { %p4057_p10 = pnand %p4056_p9, %p4050_p6 }
  0x36   :  { %4060 = shalt.err (!%p4057_p10)
}
  0x37   :  { %78 = dma.hbm_to_vmem [thread:$0]  %s4807_s6, 4096, %s73_s26, [#allocation10], %s4094_s1, %s4094_s1, %s4095_s20  }
  0x38   :  { %4081 = dma.done.wait [#allocation4], 4096  }
  0x39   :  { %4082 = vsyncadd [#allocation4], 4294963200 }
  0x3a   :  { %4083 = dma.done.wait [#allocation7], 4160  }
  0x3b   :  { %4084 = vsyncadd [#allocation7], 4294963136 }
  0x3c   :  { %4085 = dma.done.wait [#allocation10], 20480  }
  0x3d   :  { %4086 = vsyncadd [#allocation10], 4294946816  ;;  %v4098_v0 = vmov 0   ;;  %v3649_v1 = vld [vmem:[#allocation6 + $0xe4] ss:$16 sps:$4 sm:$0xff]   ;;  %v3698_v34 = vld [vmem:[#allocation3 + $0x8] sm:$0xff]  }
  0x3e   :  { %606 = vmatprep.mubr.bf16.mxu0 %v4098_v0  ;;  %959 = vmatprep.mubr.bf16.mxu1 %v4098_v0  ;;  %v3651_v2 = vld [vmem:[#allocation6 + $0xec] ss:$16 sps:$4 sm:$0xff]   ;;  %v3653_v3 = vld [vmem:[#allocation6 + $0xe0] ss:$16 sps:$4 sm:$0xff]   ;;  %v3654_v4 = vld [vmem:[#allocation6 + $0xe8] ss:$16 sps:$4 sm:$0xff]  }
  0x3f   :  { %574 = vmatprep.subr.bf16.mxu0 %v3649_v1  ;;  %927 = vmatprep.subr.bf16.mxu1 %v3651_v2  ;;  %v3655_v5 = vld [vmem:[#allocation6 + $0xc4] ss:$16 sps:$4 sm:$0xff]   ;;  %v3657_v6 = vld [vmem:[#allocation6 + $0xcc] ss:$16 sps:$4 sm:$0xff]   ;;  %v3659_v7 = vld [vmem:[#allocation6 + $0xc0] ss:$16 sps:$4 sm:$0xff]  }
  0x40   :  { %575 = vmatpush1.bf16.msra.mxu0 %v3653_v3  ;;  %928 = vmatpush1.bf16.msra.mxu1 %v3654_v4  ;;  %v3660_v8 = vld [vmem:[#allocation6 + $0xc8] ss:$16 sps:$4 sm:$0xff]   ;;  %v3661_v9 = vld [vmem:[#allocation6 + $0xa4] ss:$16 sps:$4 sm:$0xff]   ;;  %v3663_v10 = vld [vmem:[#allocation6 + $0xac] ss:$16 sps:$4 sm:$0xff]  }
  0x41   :  { %576 = vmatprep.subr.bf16.mxu0 %v3655_v5  ;;  %929 = vmatprep.subr.bf16.mxu1 %v3657_v6  ;;  %v3665_v11 = vld [vmem:[#allocation6 + $0xa0] ss:$16 sps:$4 sm:$0xff]   ;;  %v3666_v12 = vld [vmem:[#allocation6 + $0xa8] ss:$16 sps:$4 sm:$0xff]   ;;  %v3667_v13 = vld [vmem:[#allocation6 + $0x84] ss:$16 sps:$4 sm:$0xff]  }
  0x42   :  { %v3669_v14 = vld [vmem:[#allocation6 + $0x8c] ss:$16 sps:$4 sm:$0xff]   ;;  %v3671_v15 = vld [vmem:[#allocation6 + $0x80] ss:$16 sps:$4 sm:$0xff]   ;;  %v3672_v16 = vld [vmem:[#allocation6 + $0x88] ss:$16 sps:$4 sm:$0xff]  }
  0x43   :  { %v3673_v17 = vld [vmem:[#allocation6 + $0x64] ss:$16 sps:$4 sm:$0xff]   ;;  %v3675_v18 = vld [vmem:[#allocation6 + $0x6c] ss:$16 sps:$4 sm:$0xff]   ;;  %v3677_v19 = vld [vmem:[#allocation6 + $0x60] ss:$16 sps:$4 sm:$0xff]  }
  0x44   :  { %577 = vmatpush1.bf16.msra.mxu0 %v3659_v7  ;;  %930 = vmatpush1.bf16.msra.mxu1 %v3660_v8  ;;  %v3678_v20 = vld [vmem:[#allocation6 + $0x68] ss:$16 sps:$4 sm:$0xff]   ;;  %v3679_v21 = vld [vmem:[#allocation6 + $0x44] ss:$16 sps:$4 sm:$0xff]   ;;  %v3681_v22 = vld [vmem:[#allocation6 + $0x4c] ss:$16 sps:$4 sm:$0xff]  }
  0x45   :  { %578 = vmatprep.subr.bf16.mxu0 %v3661_v9  ;;  %931 = vmatprep.subr.bf16.mxu1 %v3663_v10  ;;  %v3683_v23 = vld [vmem:[#allocation6 + $0x40] ss:$16 sps:$4 sm:$0xff]   ;;  %v3684_v24 = vld [vmem:[#allocation6 + $0x48] ss:$16 sps:$4 sm:$0xff]   ;;  %v3685_v25 = vld [vmem:[#allocation6 + $0x24] ss:$16 sps:$4 sm:$0xff]  }
  0x46   :  { %v3687_v26 = vld [vmem:[#allocation6 + $0x2c] ss:$16 sps:$4 sm:$0xff]   ;;  %v3689_v27 = vld [vmem:[#allocation6 + $0x20] ss:$16 sps:$4 sm:$0xff]   ;;  %v3690_v28 = vld [vmem:[#allocation6 + $0x28] ss:$16 sps:$4 sm:$0xff]  }
  0x47   :  { %v3691_v29 = vld [vmem:[#allocation6 + $0x4] ss:$16 sps:$4 sm:$0xff]   ;;  %v3693_v30 = vld [vmem:[#allocation6 + $0xc] ss:$16 sps:$4 sm:$0xff]   ;;  %v3695_v31 = vld [vmem:[#allocation6] ss:$16 sps:$4 sm:$0xff]  }
  0x48   :  { %579 = vmatpush1.bf16.msra.mxu0 %v3665_v11  ;;  %932 = vmatpush1.bf16.msra.mxu1 %v3666_v12  ;;  %v3696_v32 = vld [vmem:[#allocation6 + $0x8] ss:$16 sps:$4 sm:$0xff]   ;;  %v3697_v33 = vld [vmem:[#allocation3] sm:$0xff]   ;;  %v3699_v35 = vld [vmem:[#allocation3 + $0x10] sm:$0xff]   ;;  %vm1886_vm0 = vcmask 1041409   ;;  %vm1888_vm1 = vcmask 1043459  }
  0x49   :  { %580 = vmatprep.subr.bf16.mxu0 %v3667_v13  ;;  %933 = vmatprep.subr.bf16.mxu1 %v3669_v14  ;;  %v3700_v36 = vld [vmem:[#allocation3 + $0x18] sm:$0xff]   ;;  %v3701_v37 = vld [vmem:[#allocation3 + $0x20] sm:$0xff]   ;;  %v3702_v38 = vld [vmem:[#allocation3 + $0x28] sm:$0xff]   ;;  %v202_v13 = vlaneseq  ;;  %vm1890_vm2 = vcmask 1045509   ;;  %vm1892_vm3 = vcmask 1047559   ;;  %vm2859_vm4 = vcmask 1041408  }
  0x4a   :  { %v3703_v39 = vld [vmem:[#allocation3 + $0x30] sm:$0xff]   ;;  %v3704_v40 = vld [vmem:[#allocation3 + $0x38] sm:$0xff]   ;;  %v3705_v41 = vld [vmem:[#allocation3 + $0x40] sm:$0xff]   ;;  %s4100_s11 = smov [#allocation12]  }
  0x4b   :  { %v3706_v42 = vld [vmem:[#allocation3 + $0x48] sm:$0xff]   ;;  %v3707_v43 = vld [vmem:[#allocation3 + $0x50] sm:$0xff]   ;;  %v3708_v44 = vld [vmem:[#allocation3 + $0x58] sm:$0xff]   ;;  %s3355_s12 = sshll.u32 %s4100_s11, 4  ;;  %s3356_s12 = int_to_ptr.vmem [resolvable:$true] %s3355_s12 }
  0x4c   :  { %581 = vmatpush1.bf16.msra.mxu0 %v3671_v15  ;;  %934 = vmatpush1.bf16.msra.mxu1 %v3672_v16  ;;  %v3709_v45 = vld [vmem:[#allocation3 + $0x60] sm:$0xff]   ;;  %v3710_v46 = vld [vmem:[#allocation3 + $0x68] sm:$0xff]   ;;  %v3711_v47 = vld [vmem:[#allocation3 + $0x70] sm:$0xff]   ;;  %v4209_v15 = vshrl.u32 %v202_v13, 7  ;;  %s4061_s13 = scalar_lea.vmem %s3356_s12, 32  ;;  %p4066_p12 = scmp.lt.s32.totalorder %s3356_s12, %s3356_s12 }
  0x4d   :  { %582 = vmatprep.subr.bf16.mxu0 %v3673_v17  ;;  %935 = vmatprep.subr.bf16.mxu1 %v3675_v18  ;;  %v3726_v48 = vld [vmem:[#allocation9 + $0xe0] ss:$16 sps:$4 sm:$0xff]   ;;  %v3728_v49 = vld [vmem:[#allocation9 + $0xe4] ss:$16 sps:$4 sm:$0xff]   ;;  %v200_v16 = vld [vmem:[#allocation8] sm:$0xf]  ;;  %p4062_p11 = scmp.ne.s32.totalorder %s3356_s12, %s4061_s13  ;;  %p4067_p13 = scmp.lt.s32.totalorder %s4061_s13, %s4061_s13 }
  0x4e   :  { %v3731_v50 = vld [vmem:[#allocation9 + $0x2e4] ss:$16 sps:$4 sm:$0xff]   ;;  %v3729_v51 = vld [vmem:[#allocation9 + $0x2e0] ss:$16 sps:$4 sm:$0xff]   ;;  %v4214_v17 = vsub.s32 0, %v4209_v15  ;;  %v4217_v18 = vsub.s32 2, %v4209_v15 }
  0x4f   :  { %v3712_v52 = vld [vmem:[#allocation3 + $0x78] sm:$0xff]   ;;  %v3734_v53 = vld [vmem:[#allocation9 + $0xc0] ss:$16 sps:$4 sm:$0xff]   ;;  %v3714_v58 = vld [vmem:[#allocation3 + $0x88] sm:$0xff]   ;;  %p4068_p0 = por %p4067_p13, %p4066_p12 }
  0x50   :  { %583 = vmatpush1.bf16.msra.mxu0 %v3677_v19  ;;  %936 = vmatpush1.bf16.msra.mxu1 %v3678_v20  ;;  %v3736_v54 = vld [vmem:[#allocation9 + $0xc4] ss:$16 sps:$4 sm:$0xff]   ;;  %v3737_v55 = vld [vmem:[#allocation9 + $0x2c0] ss:$16 sps:$4 sm:$0xff]   ;;  %4816 = vst [vmem:[#allocation17_spill] sm:$0xff] %v4217_v18 }
  0x51   :  { %584 = vmatprep.subr.bf16.mxu0 %v3679_v21  ;;  %937 = vmatprep.subr.bf16.mxu1 %v3681_v22  ;;  %v3713_v56 = vld [vmem:[#allocation3 + $0x80] sm:$0xff]   ;;  %v3739_v57 = vld [vmem:[#allocation9 + $0x2c4] ss:$16 sps:$4 sm:$0xff]   ;;  %v3715_v62 = vld [vmem:[#allocation3 + $0x90] sm:$0xff]   ;;  %p4069_p1 = pnand %p4068_p0, %p4062_p11 }
  0x52   :  { %v3741_v59 = vld [vmem:[#allocation9 + $0xa0] ss:$16 sps:$4 sm:$0xff]   ;;  %v3743_v60 = vld [vmem:[#allocation9 + $0xa4] ss:$16 sps:$4 sm:$0xff]  }
  0x53   :  { %v3744_v61 = vld [vmem:[#allocation9 + $0x2a0] ss:$16 sps:$4 sm:$0xff]   ;;  %v3746_v63 = vld [vmem:[#allocation9 + $0x2a4] ss:$16 sps:$4 sm:$0xff]  }
  0x54   :  { %585 = vmatpush1.bf16.msra.mxu0 %v3683_v23  ;;  %938 = vmatpush1.bf16.msra.mxu1 %v3684_v24  ;;  %v3716_v1 = vld [vmem:[#allocation3 + $0x98] sm:$0xff]   ;;  %v3717_v2 = vld [vmem:[#allocation3 + $0xa0] sm:$0xff]   ;;  %v3718_v7 = vld [vmem:[#allocation3 + $0xa8] sm:$0xff]   ;;  %v4220_v23 = vsub.s32 1, %v4209_v15  ;;  %v4223_v24 = vsub.s32 3, %v4209_v15 }
  0x55   :  { %586 = vmatprep.subr.bf16.mxu0 %v3685_v25  ;;  %939 = vmatprep.subr.bf16.mxu1 %v3687_v26  ;;  %v3747_v3 = vld [vmem:[#allocation9 + $0x80] ss:$16 sps:$4 sm:$0xff]   ;;  %v3749_v4 = vld [vmem:[#allocation9 + $0x84] ss:$16 sps:$4 sm:$0xff]   ;;  %v4226_v26 = vrot.slane %v200_v16, %v4214_v17 }
  0x56   :  { %v3752_v5 = vld [vmem:[#allocation9 + $0x284] ss:$16 sps:$4 sm:$0xff]   ;;  %v3750_v6 = vld [vmem:[#allocation9 + $0x280] ss:$16 sps:$4 sm:$0xff]   ;;  %4817 = vst [vmem:[#allocation18_spill] sm:$0xff] %v4220_v23  ;;  %4818 = vst [vmem:[#allocation19_spill] sm:$0xff] %v4223_v24 }
  0x57   :  { %v3753_v8 = vld [vmem:[#allocation9 + $0x60] ss:$16 sps:$4 sm:$0xff]   ;;  %v3755_v9 = vld [vmem:[#allocation9 + $0x64] ss:$16 sps:$4 sm:$0xff]  }
  0x58   :  { %587 = vmatpush1.bf16.msra.mxu0 %v3689_v27  ;;  %940 = vmatpush1.bf16.msra.mxu1 %v3690_v28  ;;  %v3756_v10 = vld [vmem:[#allocation9 + $0x260] ss:$16 sps:$4 sm:$0xff]   ;;  %v3758_v12 = vld [vmem:[#allocation9 + $0x264] ss:$16 sps:$4 sm:$0xff]   ;;  %v4229_v27 = vrot.slane %v200_v16, %v4217_v18 }
  0x59   :  { %588 = vmatprep.subr.bf16.mxu0 %v3691_v29  ;;  %941 = vmatprep.subr.bf16.mxu1 %v3693_v30  ;;  %v3719_v11 = vld [vmem:[#allocation3 + $0xb0] sm:$0xff]   ;;  %v3720_v14 = vld [vmem:[#allocation3 + $0xb8] sm:$0xff]   ;;  %v3721_v22 = vld [vmem:[#allocation3 + $0xc0] sm:$0xff]   ;;  %v4232_v30 = vrot.slane %v200_v16, %v4220_v23 }
  0x5a   :  { %v3759_v19 = vld [vmem:[#allocation9 + $0x40] ss:$16 sps:$4 sm:$0xff]   ;;  %v3761_v20 = vld [vmem:[#allocation9 + $0x44] ss:$16 sps:$4 sm:$0xff]  }
  0x5b   :  { %v3762_v21 = vld [vmem:[#allocation9 + $0x240] ss:$16 sps:$4 sm:$0xff]   ;;  %v3764_v25 = vld [vmem:[#allocation9 + $0x244] ss:$16 sps:$4 sm:$0xff]  }
  0x5c   :  { %589 = vmatpush1.bf16.msra.mxu0 %v3695_v31  ;;  %942 = vmatpush1.bf16.msra.mxu1 %v3696_v32  ;;  %v4235_v31 = vrot.slane %v200_v16, %v4223_v24 }
  0x5d   :  { %2695 = vmatprep.subr.bf16.mxu0 %v3728_v49  ;;  %2736 = vmatprep.subr.bf16.mxu1 %v3731_v50 }
  0x5f   :  { %607 = vmatmul.mubr.bf16.vlgmr.msra.gmra.mxu0 %v3697_v33  ;;  %960 = vmatmul.mubr.bf16.vlgmr.msra.gmra.mxu1 %v3697_v33 }
  0x60   :  { %616 = vmatprep.mubr.bf16.mxu0 %v4098_v0  ;;  %969 = vmatprep.mubr.bf16.mxu1 %v4098_v0 }
  0x61   :  { %2696 = vmatpush1.bf16.msra.mxu0 %v3726_v48  ;;  %2737 = vmatpush1.bf16.msra.mxu1 %v3729_v51 }
  0x62   :  { %2697 = vmatprep.subr.bf16.mxu0 %v3736_v54  ;;  %2738 = vmatprep.subr.bf16.mxu1 %v3739_v57 }
  0x65   :  { %2698 = vmatpush1.bf16.msra.mxu0 %v3734_v53  ;;  %2739 = vmatpush1.bf16.msra.mxu1 %v3737_v55 }
  0x66   :  { %2699 = vmatprep.subr.bf16.mxu0 %v3743_v60  ;;  %2740 = vmatprep.subr.bf16.mxu1 %v3746_v63 }
  0x67   :  { %617 = vmatmul.mubr.bf16.gmra.mxu0 %v3698_v34  ;;  %970 = vmatmul.mubr.bf16.gmra.mxu1 %v3698_v34 }
  0x68   :  { %626 = vmatprep.mubr.bf16.mxu0 %v4098_v0  ;;  %979 = vmatprep.mubr.bf16.mxu1 %v4098_v0 }
  0x69   :  { %2700 = vmatpush1.bf16.msra.mxu0 %v3741_v59  ;;  %2741 = vmatpush1.bf16.msra.mxu1 %v3744_v61 }
  0x6a   :  { %2701 = vmatprep.subr.bf16.mxu0 %v3749_v4  ;;  %2742 = vmatprep.subr.bf16.mxu1 %v3752_v5 }
  0x6d   :  { %2702 = vmatpush1.bf16.msra.mxu0 %v3747_v3  ;;  %2743 = vmatpush1.bf16.msra.mxu1 %v3750_v6 }
  0x6e   :  { %2703 = vmatprep.subr.bf16.mxu0 %v3755_v9  ;;  %2744 = vmatprep.subr.bf16.mxu1 %v3758_v12 }
  0x6f   :  { %627 = vmatmul.mubr.bf16.gmra.mxu0 %v3699_v35  ;;  %980 = vmatmul.mubr.bf16.gmra.mxu1 %v3699_v35 }
  0x70   :  { %636 = vmatprep.mubr.bf16.mxu0 %v4098_v0  ;;  %989 = vmatprep.mubr.bf16.mxu1 %v4098_v0 }
  0x71   :  { %2704 = vmatpush1.bf16.msra.mxu0 %v3753_v8  ;;  %2745 = vmatpush1.bf16.msra.mxu1 %v3756_v10  ;;  %v3723_v8 = vld [vmem:[#allocation3 + $0xd0] sm:$0xff]  }
  0x72   :  { %2705 = vmatprep.subr.bf16.mxu0 %v3761_v20  ;;  %2746 = vmatprep.subr.bf16.mxu1 %v3764_v25 }
  0x75   :  { %2706 = vmatpush1.bf16.msra.mxu0 %v3759_v19  ;;  %2747 = vmatpush1.bf16.msra.mxu1 %v3762_v21 }
  0x77   :  { %637 = vmatmul.mubr.bf16.gmra.mxu0 %v3700_v36  ;;  %990 = vmatmul.mubr.bf16.gmra.mxu1 %v3700_v36 }
  0x78   :  { %646 = vmatprep.mubr.bf16.mxu0 %v4098_v0  ;;  %999 = vmatprep.mubr.bf16.mxu1 %v4098_v0 }
  0x7f   :  { %647 = vmatmul.mubr.bf16.gmra.mxu0 %v3701_v37  ;;  %1000 = vmatmul.mubr.bf16.gmra.mxu1 %v3701_v37 }
  0x80   :  { %656 = vmatprep.mubr.bf16.mxu0 %v4098_v0  ;;  %1009 = vmatprep.mubr.bf16.mxu1 %v4098_v0 }
  0x87   :  { %657 = vmatmul.mubr.bf16.gmra.mxu0 %v3702_v38  ;;  %1010 = vmatmul.mubr.bf16.gmra.mxu1 %v3702_v38 }
  0x88   :  { %666 = vmatprep.mubr.bf16.mxu0 %v4098_v0  ;;  %1019 = vmatprep.mubr.bf16.mxu1 %v4098_v0 }
  0x8f   :  { %667 = vmatmul.mubr.bf16.gmra.mxu0 %v3703_v39  ;;  %1020 = vmatmul.mubr.bf16.gmra.mxu1 %v3703_v39 }
  0x90   :  { %676 = vmatprep.mubr.bf16.mxu0 %v4098_v0  ;;  %1029 = vmatprep.mubr.bf16.mxu1 %v4098_v0 }
  0x97   :  { %677 = vmatmul.mubr.bf16.gmra.mxu0 %v3704_v40  ;;  %1030 = vmatmul.mubr.bf16.gmra.mxu1 %v3704_v40  ;;  %v3722_v40 = vld [vmem:[#allocation3 + $0xc8] sm:$0xff]  }
  0x98   :  { %686 = vmatprep.mubr.bf16.mxu0 %v4098_v0  ;;  %1039 = vmatprep.mubr.bf16.mxu1 %v4098_v0 }
  0x9f   :  { %687 = vmatmul.mubr.bf16.gmra.mxu0 %v3705_v41  ;;  %1040 = vmatmul.mubr.bf16.gmra.mxu1 %v3705_v41 }
  0xa0   :  { %696 = vmatprep.mubr.bf16.mxu0 %v4098_v0  ;;  %1049 = vmatprep.mubr.bf16.mxu1 %v4098_v0 }
  0xa7   :  { %697 = vmatmul.mubr.bf16.gmra.mxu0 %v3706_v42  ;;  %1050 = vmatmul.mubr.bf16.gmra.mxu1 %v3706_v42 }
  0xa8   :  { %706 = vmatprep.mubr.bf16.mxu0 %v4098_v0  ;;  %1059 = vmatprep.mubr.bf16.mxu1 %v4098_v0 }
  0xaf   :  { %707 = vmatmul.mubr.bf16.gmra.mxu0 %v3707_v43  ;;  %1060 = vmatmul.mubr.bf16.gmra.mxu1 %v3707_v43 }
  0xb0   :  { %716 = vmatprep.mubr.bf16.mxu0 %v4098_v0  ;;  %1069 = vmatprep.mubr.bf16.mxu1 %v4098_v0 }
  0xb7   :  { %717 = vmatmul.mubr.bf16.gmra.mxu0 %v3708_v44  ;;  %1070 = vmatmul.mubr.bf16.gmra.mxu1 %v3708_v44 }
  0xb8   :  { %726 = vmatprep.mubr.bf16.mxu0 %v4098_v0  ;;  %1079 = vmatprep.mubr.bf16.mxu1 %v4098_v0 }
  0xbf   :  { %727 = vmatmul.mubr.bf16.gmra.mxu0 %v3709_v45  ;;  %1080 = vmatmul.mubr.bf16.gmra.mxu1 %v3709_v45 }
  0xc0   :  { %736 = vmatprep.mubr.bf16.mxu0 %v4098_v0  ;;  %1089 = vmatprep.mubr.bf16.mxu1 %v4098_v0 }
  0xc7   :  { %737 = vmatmul.mubr.bf16.gmra.mxu0 %v3710_v46  ;;  %1090 = vmatmul.mubr.bf16.gmra.mxu1 %v3710_v46 }
  0xc8   :  { %746 = vmatprep.mubr.bf16.mxu0 %v4098_v0  ;;  %1099 = vmatprep.mubr.bf16.mxu1 %v4098_v0 }
  0xcf   :  { %747 = vmatmul.mubr.bf16.gmra.mxu0 %v3711_v47  ;;  %1100 = vmatmul.mubr.bf16.gmra.mxu1 %v3711_v47 }
  0xd0   :  { %756 = vmatprep.mubr.bf16.mxu0 %v4098_v0  ;;  %1109 = vmatprep.mubr.bf16.mxu1 %v4098_v0 }
  0xd7   :  { %757 = vmatmul.mubr.bf16.gmra.mxu0 %v3712_v52  ;;  %1110 = vmatmul.mubr.bf16.gmra.mxu1 %v3712_v52 }
  0xd8   :  { %766 = vmatprep.mubr.bf16.mxu0 %v4098_v0  ;;  %1119 = vmatprep.mubr.bf16.mxu1 %v4098_v0 }
  0xdf   :  { %767 = vmatmul.mubr.bf16.gmra.mxu0 %v3713_v56  ;;  %1120 = vmatmul.mubr.bf16.gmra.mxu1 %v3713_v56 }
  0xe0   :  { %776 = vmatprep.mubr.bf16.mxu0 %v4098_v0  ;;  %1129 = vmatprep.mubr.bf16.mxu1 %v4098_v0 }
  0xe7   :  { %777 = vmatmul.mubr.bf16.gmra.mxu0 %v3714_v58  ;;  %1130 = vmatmul.mubr.bf16.gmra.mxu1 %v3714_v58 }
  0xe8   :  { %786 = vmatprep.mubr.bf16.mxu0 %v4098_v0  ;;  %1139 = vmatprep.mubr.bf16.mxu1 %v4098_v0 }
  0xef   :  { %787 = vmatmul.mubr.bf16.gmra.mxu0 %v3715_v62  ;;  %1140 = vmatmul.mubr.bf16.gmra.mxu1 %v3715_v62 }
  0xf0   :  { %796 = vmatprep.mubr.bf16.mxu0 %v4098_v0  ;;  %1149 = vmatprep.mubr.bf16.mxu1 %v4098_v0 }
  0xf7   :  { %797 = vmatmul.mubr.bf16.gmra.mxu0 %v3716_v1  ;;  %1150 = vmatmul.mubr.bf16.gmra.mxu1 %v3716_v1 }
  0xf8   :  { %806 = vmatprep.mubr.bf16.mxu0 %v4098_v0  ;;  %1159 = vmatprep.mubr.bf16.mxu1 %v4098_v0 }
  0xff   :  { %807 = vmatmul.mubr.bf16.gmra.mxu0 %v3717_v2  ;;  %1160 = vmatmul.mubr.bf16.gmra.mxu1 %v3717_v2 }
 0x100   :  { %816 = vmatprep.mubr.bf16.mxu0 %v4098_v0  ;;  %1169 = vmatprep.mubr.bf16.mxu1 %v4098_v0 }
 0x107   :  { %817 = vmatmul.mubr.bf16.gmra.mxu0 %v3718_v7  ;;  %1170 = vmatmul.mubr.bf16.gmra.mxu1 %v3718_v7 }
 0x108   :  { %826 = vmatprep.mubr.bf16.mxu0 %v4098_v0  ;;  %1179 = vmatprep.mubr.bf16.mxu1 %v4098_v0 }
 0x10f   :  { %827 = vmatmul.mubr.bf16.gmra.mxu0 %v3719_v11  ;;  %1180 = vmatmul.mubr.bf16.gmra.mxu1 %v3719_v11 }
 0x110   :  { %836 = vmatprep.mubr.bf16.mxu0 %v4098_v0  ;;  %1189 = vmatprep.mubr.bf16.mxu1 %v4098_v0 }
 0x117   :  { %837 = vmatmul.mubr.bf16.gmra.mxu0 %v3720_v14  ;;  %1190 = vmatmul.mubr.bf16.gmra.mxu1 %v3720_v14 }
 0x118   :  { %846 = vmatprep.mubr.bf16.mxu0 %v4098_v0  ;;  %1199 = vmatprep.mubr.bf16.mxu1 %v4098_v0 }
 0x11f   :  { %v608_v28 = vpop.f32.mrf.mxu0  ;;  %847 = vmatmul.mubr.bf16.gmra.mxu0 %v3721_v22  ;;  %v961_v29 = vpop.f32.mrf.mxu1  ;;  %1200 = vmatmul.mubr.bf16.gmra.mxu1 %v3721_v22 }
 0x120   :  { %856 = vmatprep.mubr.bf16.mxu0 %v4098_v0  ;;  %1209 = vmatprep.mubr.bf16.mxu1 %v4098_v0  ;;  %v609_v32 = vadd.f32 %v608_v28, %v4226_v26  ;;  %v962_v33 = vadd.f32 %v961_v29, %v4229_v27 }
 0x121   :  { %v610_v34 = vpop.f32.mrf.mxu0  ;;  %v963_v35 = vpop.f32.mrf.mxu1 }
 0x122   :  { %v611_v36 = vadd.f32 %v610_v34, %v4232_v30  ;;  %v964_v37 = vadd.f32 %v963_v35, %v4235_v31  ;;  %v1280_v43 = vmax.f32 %v609_v32, 0.0  ;;  %v1282_v44 = vmax.f32 %v962_v33, 0.0 }
 0x123   :  { %v612_v38 = vpop.f32.mrf.mxu0  ;;  %v965_v39 = vpop.f32.mrf.mxu1 }
 0x124   :  { %v613_v41 = vadd.f32 %v612_v38, %v4226_v26  ;;  %v966_v42 = vadd.f32 %v965_v39, %v4229_v27  ;;  %v1281_v51 = vmax.f32 %v611_v36, 0.0  ;;  %v1283_v52 = vmax.f32 %v964_v37, 0.0 }
 0x125   :  { %v614_v45 = vpop.f32.mrf.mxu0  ;;  %v967_v46 = vpop.f32.mrf.mxu1 }
 0x126   :  { %v1284_v47 = vmax.f32 %v613_v41, 0.0  ;;  %v1286_v48 = vmax.f32 %v966_v42, 0.0  ;;  %v615_v49 = vadd.f32 %v614_v45, %v4232_v30  ;;  %v968_v50 = vadd.f32 %v967_v46, %v4235_v31 }
 0x127   :  { %v618_v53 = vpop.f32.mrf.mxu0  ;;  %857 = vmatmul.mubr.bf16.gmra.mxu0 %v3722_v40  ;;  %v971_v54 = vpop.f32.mrf.mxu1  ;;  %1210 = vmatmul.mubr.bf16.gmra.mxu1 %v3722_v40 }
 0x128   :  { %v1536_v55 = vadd.f32 %v1284_v47, %v1280_v43  ;;  %v1610_v56 = vadd.f32 %v1286_v48, %v1282_v44  ;;  %v1285_v57 = vmax.f32 %v615_v49, 0.0  ;;  %v1287_v58 = vmax.f32 %v968_v50, 0.0  ;;  %866 = vmatprep.mubr.bf16.mxu0 %v4098_v0  ;;  %1219 = vmatprep.mubr.bf16.mxu1 %v4098_v0  ;;  %v3724_v50 = vld [vmem:[#allocation3 + $0xd8] sm:$0xff]  }
 0x129   :  { %v619_v59 = vadd.f32 %v618_v53, %v4226_v26  ;;  %v972_v60 = vadd.f32 %v971_v54, %v4229_v27  ;;  %v620_v61 = vpop.f32.mrf.mxu0  ;;  %v973_v62 = vpop.f32.mrf.mxu1 }
 0x12a   :  { %v1573_v63 = vadd.f32 %v1285_v57, %v1281_v51  ;;  %v1647_v1 = vadd.f32 %v1287_v58, %v1283_v52  ;;  %v621_v2 = vadd.f32 %v620_v61, %v4232_v30  ;;  %v974_v3 = vadd.f32 %v973_v62, %v4235_v31  ;;  %v3770_v61 = vld [vmem:[#allocation9 + $0x224] ss:$16 sps:$4 sm:$0xff]  }
 0x12b   :  { %v1288_v4 = vmax.f32 %v619_v59, 0.0  ;;  %v1290_v5 = vmax.f32 %v972_v60, 0.0  ;;  %v622_v6 = vpop.f32.mrf.mxu0  ;;  %v975_v7 = vpop.f32.mrf.mxu1  ;;  %v3765_v60 = vld [vmem:[#allocation9 + $0x20] ss:$16 sps:$4 sm:$0xff]   ;;  %2748 = vmatprep.subr.bf16.mxu1 %v3770_v61 }
 0x12c   :  { %v1289_v9 = vmax.f32 %v621_v2, 0.0  ;;  %v1291_v10 = vmax.f32 %v974_v3, 0.0  ;;  %v623_v11 = vadd.f32 %v622_v6, %v4226_v26  ;;  %v976_v12 = vadd.f32 %v975_v7, %v4229_v27  ;;  %v3768_v3 = vld [vmem:[#allocation9 + $0x220] ss:$16 sps:$4 sm:$0xff]  }
 0x12d   :  { %v1537_v13 = vadd.f32 %v1536_v55, %v1288_v4  ;;  %v1611_v14 = vadd.f32 %v1610_v56, %v1290_v5  ;;  %v624_v16 = vpop.f32.mrf.mxu0  ;;  %v977_v19 = vpop.f32.mrf.mxu1  ;;  %v3767_v55 = vld [vmem:[#allocation9 + $0x24] ss:$16 sps:$4 sm:$0xff]   ;;  %2749 = vmatpush1.bf16.msra.mxu1 %v3768_v3 }
 0x12e   :  { %v1574_v20 = vadd.f32 %v1573_v63, %v1289_v9  ;;  %v1648_v21 = vadd.f32 %v1647_v1, %v1291_v10  ;;  %v1292_v22 = vmax.f32 %v623_v11, 0.0  ;;  %v1294_v25 = vmax.f32 %v976_v12, 0.0  ;;  %2707 = vmatprep.subr.bf16.mxu0 %v3767_v55 }
 0x12f   :  { %v625_v28 = vadd.f32 %v624_v16, %v4232_v30  ;;  %v978_v29 = vadd.f32 %v977_v19, %v4235_v31  ;;  %v628_v32 = vpop.f32.mrf.mxu0  ;;  %867 = vmatmul.mubr.bf16.gmra.mxu0 %v3723_v8  ;;  %v981_v33 = vpop.f32.mrf.mxu1  ;;  %1220 = vmatmul.mubr.bf16.gmra.mxu1 %v3723_v8 }
 0x130   :  { %v1538_v34 = vadd.f32 %v1537_v13, %v1292_v22  ;;  %v1612_v35 = vadd.f32 %v1611_v14, %v1294_v25  ;;  %v629_v36 = vadd.f32 %v628_v32, %v4226_v26  ;;  %v982_v37 = vadd.f32 %v981_v33, %v4229_v27  ;;  %876 = vmatprep.mubr.bf16.mxu0 %v4098_v0  ;;  %v3725_v33 = vld [vmem:[#allocation3 + $0xe0] sm:$0xff]  }
 0x131   :  { %v1293_v38 = vmax.f32 %v625_v28, 0.0  ;;  %v1295_v39 = vmax.f32 %v978_v29, 0.0  ;;  %v630_v40 = vpop.f32.mrf.mxu0  ;;  %v983_v41 = vpop.f32.mrf.mxu1  ;;  %1229 = vmatprep.mubr.bf16.mxu1 %v4098_v0  ;;  %2708 = vmatpush1.bf16.msra.mxu0 %v3765_v60 }
 0x132   :  { %v1296_v42 = vmax.f32 %v629_v36, 0.0  ;;  %v1298_v43 = vmax.f32 %v982_v37, 0.0  ;;  %v631_v44 = vadd.f32 %v630_v40, %v4232_v30  ;;  %v984_v45 = vadd.f32 %v983_v41, %v4235_v31  ;;  %v3776_v40 = vld [vmem:[#allocation9 + $0x204] ss:$16 sps:$4 sm:$0xff]  }
 0x133   :  { %v1575_v46 = vadd.f32 %v1574_v20, %v1293_v38  ;;  %v1649_v47 = vadd.f32 %v1648_v21, %v1295_v39  ;;  %v632_v48 = vpop.f32.mrf.mxu0  ;;  %v985_v49 = vpop.f32.mrf.mxu1  ;;  %2750 = vmatprep.subr.bf16.mxu1 %v3776_v40 }
 0x134   :  { %v1539_v51 = vadd.f32 %v1538_v34, %v1296_v42  ;;  %v1613_v52 = vadd.f32 %v1612_v35, %v1298_v43  ;;  %v1297_v53 = vmax.f32 %v631_v44, 0.0  ;;  %v1299_v54 = vmax.f32 %v984_v45, 0.0  ;;  %v3771_v34 = vld [vmem:[#allocation9] ss:$16 sps:$4 sm:$0xff]   ;;  %v3773_v35 = vld [vmem:[#allocation9 + $0x4] ss:$16 sps:$4 sm:$0xff]  }
 0x135   :  { %v633_v56 = vadd.f32 %v632_v48, %v4226_v26  ;;  %v986_v57 = vadd.f32 %v985_v49, %v4229_v27  ;;  %v634_v58 = vpop.f32.mrf.mxu0  ;;  %v987_v59 = vpop.f32.mrf.mxu1  ;;  %2709 = vmatprep.subr.bf16.mxu0 %v3773_v35  ;;  %v3774_v45 = vld [vmem:[#allocation9 + $0x200] ss:$16 sps:$4 sm:$0xff]  }
 0x136   :  { %v1576_v62 = vadd.f32 %v1575_v46, %v1297_v53  ;;  %v1650_v63 = vadd.f32 %v1649_v47, %v1299_v54  ;;  %v635_v1 = vadd.f32 %v634_v58, %v4232_v30  ;;  %v988_v2 = vadd.f32 %v987_v59, %v4235_v31  ;;  %2710 = vmatpush1.bf16.msra.mxu0 %v3771_v34 }
 0x137   :  { %v1300_v4 = vmax.f32 %v633_v56, 0.0  ;;  %v1302_v5 = vmax.f32 %v986_v57, 0.0  ;;  %v638_v6 = vpop.f32.mrf.mxu0  ;;  %877 = vmatmul.mubr.bf16.gmra.mxu0 %v3724_v50  ;;  %v991_v7 = vpop.f32.mrf.mxu1  ;;  %1230 = vmatmul.mubr.bf16.gmra.mxu1 %v3724_v50 }
 0x138   :  { %v1301_v8 = vmax.f32 %v635_v1, 0.0  ;;  %v1303_v9 = vmax.f32 %v988_v2, 0.0  ;;  %v639_v10 = vadd.f32 %v638_v6, %v4226_v26  ;;  %v992_v11 = vadd.f32 %v991_v7, %v4229_v27  ;;  %886 = vmatprep.mubr.bf16.mxu0 %v4098_v0  ;;  %1239 = vmatprep.mubr.bf16.mxu1 %v4098_v0  ;;  %v3732_v7 = vld [vmem:[#allocation3 + $0xe8] sm:$0xff]  }
 0x139   :  { %v1540_v12 = vadd.f32 %v1539_v51, %v1300_v4  ;;  %v1614_v13 = vadd.f32 %v1613_v52, %v1302_v5  ;;  %v640_v14 = vpop.f32.mrf.mxu0  ;;  %v993_v16 = vpop.f32.mrf.mxu1  ;;  %2751 = vmatpush1.bf16.msra.mxu1 %v3774_v45  ;;  %v3777_v45 = vld [vmem:[#allocation9 + $0x1e0] ss:$16 sps:$4 sm:$0xff]  }
 0x13a   :  { %v1577_v19 = vadd.f32 %v1576_v62, %v1301_v8  ;;  %v1651_v20 = vadd.f32 %v1650_v63, %v1303_v9  ;;  %v1304_v21 = vmax.f32 %v639_v10, 0.0  ;;  %v1306_v22 = vmax.f32 %v992_v11, 0.0 }
 0x13b   :  { %v641_v25 = vadd.f32 %v640_v14, %v4232_v30  ;;  %v994_v28 = vadd.f32 %v993_v16, %v4235_v31  ;;  %v642_v29 = vpop.f32.mrf.mxu0  ;;  %v995_v32 = vpop.f32.mrf.mxu1 }
 0x13c   :  { %v1541_v36 = vadd.f32 %v1540_v12, %v1304_v21  ;;  %v1615_v37 = vadd.f32 %v1614_v13, %v1306_v22  ;;  %v643_v38 = vadd.f32 %v642_v29, %v4226_v26  ;;  %v996_v39 = vadd.f32 %v995_v32, %v4229_v27 }
 0x13d   :  { %v1305_v41 = vmax.f32 %v641_v25, 0.0  ;;  %v1307_v42 = vmax.f32 %v994_v28, 0.0  ;;  %v644_v43 = vpop.f32.mrf.mxu0  ;;  %v997_v44 = vpop.f32.mrf.mxu1 }
 0x13e   :  { %v1308_v46 = vmax.f32 %v643_v38, 0.0  ;;  %v1310_v47 = vmax.f32 %v996_v39, 0.0  ;;  %v645_v48 = vadd.f32 %v644_v43, %v4232_v30  ;;  %v998_v49 = vadd.f32 %v997_v44, %v4235_v31 }
 0x13f   :  { %v1578_v50 = vadd.f32 %v1577_v19, %v1305_v41  ;;  %v1652_v51 = vadd.f32 %v1651_v20, %v1307_v42  ;;  %v648_v52 = vpop.f32.mrf.mxu0  ;;  %887 = vmatmul.mubr.bf16.gmra.mxu0 %v3725_v33  ;;  %v1001_v53 = vpop.f32.mrf.mxu1  ;;  %1240 = vmatmul.mubr.bf16.gmra.mxu1 %v3725_v33 }
 0x140   :  { %v1542_v54 = vadd.f32 %v1541_v36, %v1308_v46  ;;  %v1616_v55 = vadd.f32 %v1615_v37, %v1310_v47  ;;  %v1309_v56 = vmax.f32 %v645_v48, 0.0  ;;  %v1311_v57 = vmax.f32 %v998_v49, 0.0  ;;  %896 = vmatprep.mubr.bf16.mxu0 %v4098_v0  ;;  %1249 = vmatprep.mubr.bf16.mxu1 %v4098_v0  ;;  %v3779_v46 = vld [vmem:[#allocation9 + $0x1e4] ss:$16 sps:$4 sm:$0xff]  }
 0x141   :  { %v649_v58 = vadd.f32 %v648_v52, %v4226_v26  ;;  %v1002_v59 = vadd.f32 %v1001_v53, %v4229_v27  ;;  %v650_v60 = vpop.f32.mrf.mxu0  ;;  %v1003_v61 = vpop.f32.mrf.mxu1  ;;  %v3780_v52 = vld [vmem:[#allocation9 + $0x3e0] ss:$16 sps:$4 sm:$0xff]   ;;  %v3782_v53 = vld [vmem:[#allocation9 + $0x3e4] ss:$16 sps:$4 sm:$0xff]   ;;  %2711 = vmatprep.subr.bf16.mxu0 %v3779_v46 }
 0x142   :  { %v1579_v62 = vadd.f32 %v1578_v50, %v1309_v56  ;;  %v1653_v63 = vadd.f32 %v1652_v51, %v1311_v57  ;;  %v651_v1 = vadd.f32 %v650_v60, %v4232_v30  ;;  %v1004_v2 = vadd.f32 %v1003_v61, %v4235_v31  ;;  %v3733_v51 = vld [vmem:[#allocation3 + $0xf0] sm:$0xff]   ;;  %2752 = vmatprep.subr.bf16.mxu1 %v3782_v53 }
 0x143   :  { %v1312_v3 = vmax.f32 %v649_v58, 0.0  ;;  %v1314_v4 = vmax.f32 %v1002_v59, 0.0  ;;  %v652_v5 = vpop.f32.mrf.mxu0  ;;  %v1005_v6 = vpop.f32.mrf.mxu1  ;;  %2712 = vmatpush2.bf16.msra.mxu0 %v3777_v45  ;;  %2753 = vmatpush2.bf16.msra.mxu1 %v3780_v52 }
 0x144   :  { %v1313_v8 = vmax.f32 %v651_v1, 0.0  ;;  %v1315_v9 = vmax.f32 %v1004_v2, 0.0  ;;  %v653_v10 = vadd.f32 %v652_v5, %v4226_v26  ;;  %v1006_v11 = vadd.f32 %v1005_v6, %v4229_v27 }
 0x145   :  { %v1543_v12 = vadd.f32 %v1542_v54, %v1312_v3  ;;  %v1617_v13 = vadd.f32 %v1616_v55, %v1314_v4  ;;  %v654_v14 = vpop.f32.mrf.mxu0  ;;  %v1007_v16 = vpop.f32.mrf.mxu1 }
 0x146   :  { %v1580_v19 = vadd.f32 %v1579_v62, %v1313_v8  ;;  %v1654_v20 = vadd.f32 %v1653_v63, %v1315_v9  ;;  %v1316_v21 = vmax.f32 %v653_v10, 0.0  ;;  %v1318_v22 = vmax.f32 %v1006_v11, 0.0 }
 0x147   :  { %v655_v25 = vadd.f32 %v654_v14, %v4232_v30  ;;  %v1008_v28 = vadd.f32 %v1007_v16, %v4235_v31  ;;  %v658_v29 = vpop.f32.mrf.mxu0  ;;  %897 = vmatmul.mubr.bf16.gmra.mxu0 %v3732_v7  ;;  %v1011_v32 = vpop.f32.mrf.mxu1  ;;  %1250 = vmatmul.mubr.bf16.gmra.mxu1 %v3732_v7 }
 0x148   :  { %v1544_v33 = vadd.f32 %v1543_v12, %v1316_v21  ;;  %v1618_v34 = vadd.f32 %v1617_v13, %v1318_v22  ;;  %v659_v35 = vadd.f32 %v658_v29, %v4226_v26  ;;  %v1012_v36 = vadd.f32 %v1011_v32, %v4229_v27  ;;  %906 = vmatprep.mubr.bf16.mxu0 %v4098_v0 }
 0x149   :  { %v1317_v37 = vmax.f32 %v655_v25, 0.0  ;;  %v1319_v38 = vmax.f32 %v1008_v28, 0.0  ;;  %v660_v39 = vpop.f32.mrf.mxu0  ;;  %v1013_v40 = vpop.f32.mrf.mxu1  ;;  %1259 = vmatprep.mubr.bf16.mxu1 %v4098_v0  ;;  %v3740_v28 = vld [vmem:[#allocation3 + $0xf8] sm:$0xff]  }
 0x14a   :  { %v1320_v41 = vmax.f32 %v659_v35, 0.0  ;;  %v1322_v42 = vmax.f32 %v1012_v36, 0.0  ;;  %v661_v43 = vadd.f32 %v660_v39, %v4232_v30  ;;  %v1014_v44 = vadd.f32 %v1013_v40, %v4235_v31 }
 0x14b   :  { %v1581_v47 = vadd.f32 %v1580_v19, %v1317_v37  ;;  %v1655_v48 = vadd.f32 %v1654_v20, %v1319_v38  ;;  %v662_v49 = vpop.f32.mrf.mxu0  ;;  %v1015_v50 = vpop.f32.mrf.mxu1 }
 0x14c   :  { %v1545_v54 = vadd.f32 %v1544_v33, %v1320_v41  ;;  %v1619_v55 = vadd.f32 %v1618_v34, %v1322_v42  ;;  %v1321_v56 = vmax.f32 %v661_v43, 0.0  ;;  %v1323_v57 = vmax.f32 %v1014_v44, 0.0 }
 0x14d   :  { %v663_v58 = vadd.f32 %v662_v49, %v4226_v26  ;;  %v1016_v59 = vadd.f32 %v1015_v50, %v4229_v27  ;;  %v664_v60 = vpop.f32.mrf.mxu0  ;;  %v1017_v61 = vpop.f32.mrf.mxu1 }
 0x14e   :  { %v1582_v62 = vadd.f32 %v1581_v47, %v1321_v56  ;;  %v1656_v63 = vadd.f32 %v1655_v48, %v1323_v57  ;;  %v665_v1 = vadd.f32 %v664_v60, %v4232_v30  ;;  %v1018_v2 = vadd.f32 %v1017_v61, %v4235_v31 }
 0x14f   :  { %v1324_v3 = vmax.f32 %v663_v58, 0.0  ;;  %v1326_v4 = vmax.f32 %v1016_v59, 0.0  ;;  %v668_v5 = vpop.f32.mrf.mxu0  ;;  %907 = vmatmul.mubr.bf16.gmra.mxu0 %v3733_v51  ;;  %v1021_v6 = vpop.f32.mrf.mxu1  ;;  %1260 = vmatmul.mubr.bf16.gmra.mxu1 %v3733_v51 }
 0x150   :  { %v669_v7 = vadd.f32 %v668_v5, %v4226_v26  ;;  %v1022_v8 = vadd.f32 %v1021_v6, %v4229_v27  ;;  %916 = vmatprep.mubr.bf16.mxu0 %v4098_v0  ;;  %1269 = vmatprep.mubr.bf16.mxu1 %v4098_v0  ;;  %v1325_v11 = vmax.f32 %v665_v1, 0.0  ;;  %v1327_v12 = vmax.f32 %v1018_v2, 0.0  ;;  %v3783_v1 = vld [vmem:[#allocation9 + $0x1c0] ss:$16 sps:$4 sm:$0xff]   ;;  %v3785_v2 = vld [vmem:[#allocation9 + $0x1c4] ss:$16 sps:$4 sm:$0xff]  }
 0x151   :  { %v1546_v9 = vadd.f32 %v1545_v54, %v1324_v3  ;;  %v1620_v10 = vadd.f32 %v1619_v55, %v1326_v4  ;;  %v670_v13 = vpop.f32.mrf.mxu0  ;;  %v1023_v14 = vpop.f32.mrf.mxu1  ;;  %2713 = vmatprep.subr.bf16.mxu0 %v3785_v2 }
 0x152   :  { %v1328_v16 = vmax.f32 %v669_v7, 0.0  ;;  %v1330_v19 = vmax.f32 %v1022_v8, 0.0  ;;  %v671_v20 = vadd.f32 %v670_v13, %v4232_v30  ;;  %v1024_v21 = vadd.f32 %v1023_v14, %v4235_v31  ;;  %v3786_v7 = vld [vmem:[#allocation9 + $0x3c0] ss:$16 sps:$4 sm:$0xff]   ;;  %v3788_v8 = vld [vmem:[#allocation9 + $0x3c4] ss:$16 sps:$4 sm:$0xff]   ;;  %2714 = vmatpush2.bf16.msra.mxu0 %v3783_v1 }
 0x153   :  { %v672_v22 = vpop.f32.mrf.mxu0  ;;  %v1025_v25 = vpop.f32.mrf.mxu1  ;;  %v1583_v34 = vadd.f32 %v1582_v62, %v1325_v11  ;;  %v1657_v35 = vadd.f32 %v1656_v63, %v1327_v12  ;;  %2754 = vmatprep.subr.bf16.mxu1 %v3788_v8 }
 0x154   :  { %v1547_v29 = vadd.f32 %v1546_v9, %v1328_v16  ;;  %v1621_v32 = vadd.f32 %v1620_v10, %v1330_v19  ;;  %v673_v33 = vadd.f32 %v672_v22, %v4226_v26  ;;  %v1026_v0 = vadd.f32 %v1025_v25, %v4229_v27  ;;  %2755 = vmatpush2.bf16.msra.mxu1 %v3786_v7 }
 0x155   :  { %v1329_v36 = vmax.f32 %v671_v20, 0.0  ;;  %v1331_v37 = vmax.f32 %v1024_v21, 0.0  ;;  %v674_v38 = vpop.f32.mrf.mxu0  ;;  %v1027_v39 = vpop.f32.mrf.mxu1 }
 0x156   :  { %v1332_v40 = vmax.f32 %v673_v33, 0.0  ;;  %v1334_v41 = vmax.f32 %v1026_v0, 0.0  ;;  %v675_v42 = vadd.f32 %v674_v38, %v4232_v30  ;;  %v1028_v43 = vadd.f32 %v1027_v39, %v4235_v31 }
 0x157   :  { %v1584_v44 = vadd.f32 %v1583_v34, %v1329_v36  ;;  %v1658_v45 = vadd.f32 %v1657_v35, %v1331_v37  ;;  %v678_v46 = vpop.f32.mrf.mxu0  ;;  %917 = vmatmul.mubr.bf16.gmra.mxu0 %v3740_v28  ;;  %v1031_v47 = vpop.f32.mrf.mxu1  ;;  %1270 = vmatmul.mubr.bf16.gmra.mxu1 %v3740_v28 }
 0x158   :  { %v1548_v48 = vadd.f32 %v1547_v29, %v1332_v40  ;;  %v1622_v49 = vadd.f32 %v1621_v32, %v1334_v41  ;;  %v1333_v50 = vmax.f32 %v675_v42, 0.0  ;;  %v1335_v51 = vmax.f32 %v1028_v43, 0.0 }
 0x159   :  { %v679_v52 = vadd.f32 %v678_v46, %v4226_v26  ;;  %v1032_v53 = vadd.f32 %v1031_v47, %v4229_v27  ;;  %v680_v54 = vpop.f32.mrf.mxu0  ;;  %v1033_v55 = vpop.f32.mrf.mxu1 }
 0x15a   :  { %v681_v56 = vadd.f32 %v680_v54, %v4232_v30  ;;  %v1034_v57 = vadd.f32 %v1033_v55, %v4235_v31  ;;  %v1585_v58 = vadd.f32 %v1584_v44, %v1333_v50  ;;  %v1659_v59 = vadd.f32 %v1658_v45, %v1335_v51 }
 0x15b   :  { %v1336_v60 = vmax.f32 %v679_v52, 0.0  ;;  %v1338_v61 = vmax.f32 %v1032_v53, 0.0  ;;  %v682_v62 = vpop.f32.mrf.mxu0  ;;  %v1035_v63 = vpop.f32.mrf.mxu1 }
 0x15c   :  { %v1337_v3 = vmax.f32 %v681_v56, 0.0  ;;  %v1339_v4 = vmax.f32 %v1034_v57, 0.0  ;;  %v683_v5 = vadd.f32 %v682_v62, %v4226_v26  ;;  %v1036_v6 = vadd.f32 %v1035_v63, %v4229_v27 }
 0x15d   :  { %v1549_v9 = vadd.f32 %v1548_v48, %v1336_v60  ;;  %v1623_v10 = vadd.f32 %v1622_v49, %v1338_v61  ;;  %v684_v11 = vpop.f32.mrf.mxu0  ;;  %v1037_v12 = vpop.f32.mrf.mxu1 }
 0x15e   :  { %v1586_v13 = vadd.f32 %v1585_v58, %v1337_v3  ;;  %v1660_v14 = vadd.f32 %v1659_v59, %v1339_v4  ;;  %v1340_v16 = vmax.f32 %v683_v5, 0.0  ;;  %v1342_v19 = vmax.f32 %v1036_v6, 0.0 }
 0x15f   :  { %v685_v20 = vadd.f32 %v684_v11, %v4232_v30  ;;  %v1038_v21 = vadd.f32 %v1037_v12, %v4235_v31  ;;  %v688_v22 = vpop.f32.mrf.mxu0  ;;  %v1041_v25 = vpop.f32.mrf.mxu1 }
 0x160   :  { %v1550_v28 = vadd.f32 %v1549_v9, %v1340_v16  ;;  %v1624_v29 = vadd.f32 %v1623_v10, %v1342_v19  ;;  %v689_v32 = vadd.f32 %v688_v22, %v4226_v26  ;;  %v1042_v33 = vadd.f32 %v1041_v25, %v4229_v27  ;;  %v3791_v16 = vld [vmem:[#allocation9 + $0x1a4] ss:$16 sps:$4 sm:$0xff]   ;;  %v3792_v19 = vld [vmem:[#allocation9 + $0x3a0] ss:$16 sps:$4 sm:$0xff]  }
 0x161   :  { %v1341_v0 = vmax.f32 %v685_v20, 0.0  ;;  %v1343_v34 = vmax.f32 %v1038_v21, 0.0  ;;  %v690_v35 = vpop.f32.mrf.mxu0  ;;  %v1043_v36 = vpop.f32.mrf.mxu1  ;;  %2715 = vmatprep.subr.bf16.mxu0 %v3791_v16 }
 0x162   :  { %v1344_v37 = vmax.f32 %v689_v32, 0.0  ;;  %v1346_v38 = vmax.f32 %v1042_v33, 0.0  ;;  %v691_v39 = vadd.f32 %v690_v35, %v4232_v30  ;;  %v1044_v40 = vadd.f32 %v1043_v36, %v4235_v31 }
 0x163   :  { %v1587_v41 = vadd.f32 %v1586_v13, %v1341_v0  ;;  %v1661_v42 = vadd.f32 %v1660_v14, %v1343_v34  ;;  %v692_v43 = vpop.f32.mrf.mxu0  ;;  %v1045_v44 = vpop.f32.mrf.mxu1  ;;  %v3789_v14 = vld [vmem:[#allocation9 + $0x1a0] ss:$16 sps:$4 sm:$0xff]  }
 0x164   :  { %v1551_v45 = vadd.f32 %v1550_v28, %v1344_v37  ;;  %v1625_v46 = vadd.f32 %v1624_v29, %v1346_v38  ;;  %v1345_v47 = vmax.f32 %v691_v39, 0.0  ;;  %v1347_v48 = vmax.f32 %v1044_v40, 0.0  ;;  %v3794_v28 = vld [vmem:[#allocation9 + $0x3a4] ss:$16 sps:$4 sm:$0xff]   ;;  %2716 = vmatpush2.bf16.msra.mxu0 %v3789_v14 }
 0x165   :  { %v693_v49 = vadd.f32 %v692_v43, %v4226_v26  ;;  %v1046_v50 = vadd.f32 %v1045_v44, %v4229_v27  ;;  %v694_v51 = vpop.f32.mrf.mxu0  ;;  %v1047_v52 = vpop.f32.mrf.mxu1  ;;  %2756 = vmatprep.subr.bf16.mxu1 %v3794_v28 }
 0x166   :  { %v1588_v53 = vadd.f32 %v1587_v41, %v1345_v47  ;;  %v1662_v54 = vadd.f32 %v1661_v42, %v1347_v48  ;;  %v695_v55 = vadd.f32 %v694_v51, %v4232_v30  ;;  %v1048_v56 = vadd.f32 %v1047_v52, %v4235_v31  ;;  %2757 = vmatpush2.bf16.msra.mxu1 %v3792_v19 }
 0x167   :  { %v1348_v57 = vmax.f32 %v693_v49, 0.0  ;;  %v1350_v58 = vmax.f32 %v1046_v50, 0.0  ;;  %v698_v59 = vpop.f32.mrf.mxu0  ;;  %v1051_v60 = vpop.f32.mrf.mxu1 }
 0x168   :  { %v1349_v61 = vmax.f32 %v695_v55, 0.0  ;;  %v1351_v62 = vmax.f32 %v1048_v56, 0.0  ;;  %v699_v63 = vadd.f32 %v698_v59, %v4226_v26  ;;  %v1052_v1 = vadd.f32 %v1051_v60, %v4229_v27 }
 0x169   :  { %v1552_v2 = vadd.f32 %v1551_v45, %v1348_v57  ;;  %v1626_v3 = vadd.f32 %v1625_v46, %v1350_v58  ;;  %v700_v4 = vpop.f32.mrf.mxu0  ;;  %v1053_v5 = vpop.f32.mrf.mxu1 }
 0x16a   :  { %v1589_v6 = vadd.f32 %v1588_v53, %v1349_v61  ;;  %v1663_v7 = vadd.f32 %v1662_v54, %v1351_v62  ;;  %v1352_v8 = vmax.f32 %v699_v63, 0.0  ;;  %v1354_v9 = vmax.f32 %v1052_v1, 0.0 }
 0x16b   :  { %v701_v10 = vadd.f32 %v700_v4, %v4232_v30  ;;  %v1054_v11 = vadd.f32 %v1053_v5, %v4235_v31  ;;  %v702_v12 = vpop.f32.mrf.mxu0  ;;  %v1055_v13 = vpop.f32.mrf.mxu1 }
 0x16c   :  { %v1553_v20 = vadd.f32 %v1552_v2, %v1352_v8  ;;  %v1627_v21 = vadd.f32 %v1626_v3, %v1354_v9  ;;  %v703_v22 = vadd.f32 %v702_v12, %v4226_v26  ;;  %v1056_v25 = vadd.f32 %v1055_v13, %v4229_v27 }
 0x16d   :  { %v1353_v29 = vmax.f32 %v701_v10, 0.0  ;;  %v1355_v32 = vmax.f32 %v1054_v11, 0.0  ;;  %v704_v33 = vpop.f32.mrf.mxu0  ;;  %v1057_v0 = vpop.f32.mrf.mxu1 }
 0x16e   :  { %v1356_v34 = vmax.f32 %v703_v22, 0.0  ;;  %v1358_v35 = vmax.f32 %v1056_v25, 0.0  ;;  %v705_v36 = vadd.f32 %v704_v33, %v4232_v30  ;;  %v1058_v37 = vadd.f32 %v1057_v0, %v4235_v31  ;;  %v3797_v33 = vld [vmem:[#allocation9 + $0x184] ss:$16 sps:$4 sm:$0xff]  }
 0x16f   :  { %v1590_v38 = vadd.f32 %v1589_v6, %v1353_v29  ;;  %v1664_v39 = vadd.f32 %v1663_v7, %v1355_v32  ;;  %v708_v40 = vpop.f32.mrf.mxu0  ;;  %v1061_v41 = vpop.f32.mrf.mxu1  ;;  %v3795_v32 = vld [vmem:[#allocation9 + $0x180] ss:$16 sps:$4 sm:$0xff]   ;;  %2717 = vmatprep.subr.bf16.mxu0 %v3797_v33 }
 0x170   :  { %v1554_v42 = vadd.f32 %v1553_v20, %v1356_v34  ;;  %v1628_v43 = vadd.f32 %v1627_v21, %v1358_v35  ;;  %v1357_v44 = vmax.f32 %v705_v36, 0.0  ;;  %v1359_v45 = vmax.f32 %v1058_v37, 0.0  ;;  %v3798_v37 = vld [vmem:[#allocation9 + $0x380] ss:$16 sps:$4 sm:$0xff]   ;;  %2718 = vmatpush2.bf16.msra.mxu0 %v3795_v32 }
 0x171   :  { %v709_v46 = vadd.f32 %v708_v40, %v4226_v26  ;;  %v1062_v47 = vadd.f32 %v1061_v41, %v4229_v27  ;;  %v710_v48 = vpop.f32.mrf.mxu0  ;;  %v1063_v49 = vpop.f32.mrf.mxu1 }
 0x172   :  { %v1591_v50 = vadd.f32 %v1590_v38, %v1357_v44  ;;  %v1665_v51 = vadd.f32 %v1664_v39, %v1359_v45  ;;  %v711_v52 = vadd.f32 %v710_v48, %v4232_v30  ;;  %v1064_v53 = vadd.f32 %v1063_v49, %v4235_v31  ;;  %v3800_v38 = vld [vmem:[#allocation9 + $0x384] ss:$16 sps:$4 sm:$0xff]  }
 0x173   :  { %v1360_v54 = vmax.f32 %v709_v46, 0.0  ;;  %v1362_v55 = vmax.f32 %v1062_v47, 0.0  ;;  %v712_v56 = vpop.f32.mrf.mxu0  ;;  %v1065_v57 = vpop.f32.mrf.mxu1  ;;  %2758 = vmatprep.subr.bf16.mxu1 %v3800_v38 }
 0x174   :  { %v1361_v58 = vmax.f32 %v711_v52, 0.0  ;;  %v1363_v59 = vmax.f32 %v1064_v53, 0.0  ;;  %v713_v60 = vadd.f32 %v712_v56, %v4226_v26  ;;  %v1066_v61 = vadd.f32 %v1065_v57, %v4229_v27  ;;  %2759 = vmatpush2.bf16.msra.mxu1 %v3798_v37 }
 0x175   :  { %v1555_v62 = vadd.f32 %v1554_v42, %v1360_v54  ;;  %v1629_v63 = vadd.f32 %v1628_v43, %v1362_v55  ;;  %v714_v1 = vpop.f32.mrf.mxu0  ;;  %v1067_v2 = vpop.f32.mrf.mxu1 }
 0x176   :  { %v1592_v3 = vadd.f32 %v1591_v50, %v1361_v58  ;;  %v1666_v4 = vadd.f32 %v1665_v51, %v1363_v59  ;;  %v1364_v5 = vmax.f32 %v713_v60, 0.0  ;;  %v1366_v6 = vmax.f32 %v1066_v61, 0.0 }
 0x177   :  { %v715_v7 = vadd.f32 %v714_v1, %v4232_v30  ;;  %v1068_v8 = vadd.f32 %v1067_v2, %v4235_v31  ;;  %v718_v9 = vpop.f32.mrf.mxu0  ;;  %v1071_v10 = vpop.f32.mrf.mxu1 }
 0x178   :  { %v1556_v11 = vadd.f32 %v1555_v62, %v1364_v5  ;;  %v1630_v12 = vadd.f32 %v1629_v63, %v1366_v6  ;;  %v719_v13 = vadd.f32 %v718_v9, %v4226_v26  ;;  %v1072_v14 = vadd.f32 %v1071_v10, %v4229_v27 }
 0x179   :  { %v1365_v16 = vmax.f32 %v715_v7, 0.0  ;;  %v1367_v19 = vmax.f32 %v1068_v8, 0.0  ;;  %v720_v20 = vpop.f32.mrf.mxu0  ;;  %v1073_v21 = vpop.f32.mrf.mxu1 }
 0x17a   :  { %v1368_v22 = vmax.f32 %v719_v13, 0.0  ;;  %v1370_v25 = vmax.f32 %v1072_v14, 0.0  ;;  %v721_v28 = vadd.f32 %v720_v20, %v4232_v30  ;;  %v1074_v29 = vadd.f32 %v1073_v21, %v4235_v31 }
 0x17b   :  { %v1593_v0 = vadd.f32 %v1592_v3, %v1365_v16  ;;  %v1667_v34 = vadd.f32 %v1666_v4, %v1367_v19  ;;  %v722_v35 = vpop.f32.mrf.mxu0  ;;  %v1075_v36 = vpop.f32.mrf.mxu1 }
 0x17c   :  { %v1557_v39 = vadd.f32 %v1556_v11, %v1368_v22  ;;  %v1631_v40 = vadd.f32 %v1630_v12, %v1370_v25  ;;  %v1369_v41 = vmax.f32 %v721_v28, 0.0  ;;  %v1371_v42 = vmax.f32 %v1074_v29, 0.0 }
 0x17d   :  { %v723_v43 = vadd.f32 %v722_v35, %v4226_v26  ;;  %v1076_v44 = vadd.f32 %v1075_v36, %v4229_v27  ;;  %v724_v45 = vpop.f32.mrf.mxu0  ;;  %v1077_v46 = vpop.f32.mrf.mxu1 }
 0x17e   :  { %v1594_v47 = vadd.f32 %v1593_v0, %v1369_v41  ;;  %v1668_v48 = vadd.f32 %v1667_v34, %v1371_v42  ;;  %v725_v49 = vadd.f32 %v724_v45, %v4232_v30  ;;  %v1078_v50 = vadd.f32 %v1077_v46, %v4235_v31 }
 0x17f   :  { %v1372_v51 = vmax.f32 %v723_v43, 0.0  ;;  %v1374_v52 = vmax.f32 %v1076_v44, 0.0  ;;  %v728_v53 = vpop.f32.mrf.mxu0  ;;  %v1081_v54 = vpop.f32.mrf.mxu1 }
 0x180   :  { %v1373_v55 = vmax.f32 %v725_v49, 0.0  ;;  %v1375_v56 = vmax.f32 %v1078_v50, 0.0  ;;  %v729_v57 = vadd.f32 %v728_v53, %v4226_v26  ;;  %v1082_v58 = vadd.f32 %v1081_v54, %v4229_v27  ;;  %v3803_v49 = vld [vmem:[#allocation9 + $0x164] ss:$16 sps:$4 sm:$0xff]   ;;  %v3804_v54 = vld [vmem:[#allocation9 + $0x360] ss:$16 sps:$4 sm:$0xff]  }
 0x181   :  { %v1558_v59 = vadd.f32 %v1557_v39, %v1372_v51  ;;  %v1632_v60 = vadd.f32 %v1631_v40, %v1374_v52  ;;  %v730_v61 = vpop.f32.mrf.mxu0  ;;  %v1083_v62 = vpop.f32.mrf.mxu1  ;;  %2719 = vmatprep.subr.bf16.mxu0 %v3803_v49 }
 0x182   :  { %v1595_v63 = vadd.f32 %v1594_v47, %v1373_v55  ;;  %v1669_v1 = vadd.f32 %v1668_v48, %v1375_v56  ;;  %v1376_v2 = vmax.f32 %v729_v57, 0.0  ;;  %v1378_v3 = vmax.f32 %v1082_v58, 0.0  ;;  %v3801_v48 = vld [vmem:[#allocation9 + $0x160] ss:$16 sps:$4 sm:$0xff]   ;;  %v3806_v55 = vld [vmem:[#allocation9 + $0x364] ss:$16 sps:$4 sm:$0xff]  }
 0x183   :  { %v731_v4 = vadd.f32 %v730_v61, %v4232_v30  ;;  %v1084_v5 = vadd.f32 %v1083_v62, %v4235_v31  ;;  %v732_v6 = vpop.f32.mrf.mxu0  ;;  %v1085_v7 = vpop.f32.mrf.mxu1  ;;  %2760 = vmatprep.subr.bf16.mxu1 %v3806_v55  ;;  %2720 = vmatpush2.bf16.msra.mxu0 %v3801_v48 }
 0x184   :  { %v1559_v8 = vadd.f32 %v1558_v59, %v1376_v2  ;;  %v1633_v9 = vadd.f32 %v1632_v60, %v1378_v3  ;;  %v733_v10 = vadd.f32 %v732_v6, %v4226_v26  ;;  %v1086_v11 = vadd.f32 %v1085_v7, %v4229_v27  ;;  %2761 = vmatpush2.bf16.msra.mxu1 %v3804_v54 }
 0x185   :  { %v1377_v12 = vmax.f32 %v731_v4, 0.0  ;;  %v1379_v13 = vmax.f32 %v1084_v5, 0.0  ;;  %v734_v14 = vpop.f32.mrf.mxu0  ;;  %v1087_v16 = vpop.f32.mrf.mxu1 }
 0x186   :  { %v1380_v19 = vmax.f32 %v733_v10, 0.0  ;;  %v1382_v20 = vmax.f32 %v1086_v11, 0.0  ;;  %v735_v21 = vadd.f32 %v734_v14, %v4232_v30  ;;  %v1088_v22 = vadd.f32 %v1087_v16, %v4235_v31 }
 0x187   :  { %v1596_v25 = vadd.f32 %v1595_v63, %v1377_v12  ;;  %v1670_v28 = vadd.f32 %v1669_v1, %v1379_v13  ;;  %v738_v29 = vpop.f32.mrf.mxu0  ;;  %v1091_v32 = vpop.f32.mrf.mxu1 }
 0x188   :  { %v1560_v33 = vadd.f32 %v1559_v8, %v1380_v19  ;;  %v1634_v0 = vadd.f32 %v1633_v9, %v1382_v20  ;;  %v1381_v34 = vmax.f32 %v735_v21, 0.0  ;;  %v1383_v35 = vmax.f32 %v1088_v22, 0.0 }
 0x189   :  { %v739_v36 = vadd.f32 %v738_v29, %v4226_v26  ;;  %v1092_v37 = vadd.f32 %v1091_v32, %v4229_v27  ;;  %v740_v38 = vpop.f32.mrf.mxu0  ;;  %v1093_v39 = vpop.f32.mrf.mxu1 }
 0x18a   :  { %v1597_v40 = vadd.f32 %v1596_v25, %v1381_v34  ;;  %v1671_v41 = vadd.f32 %v1670_v28, %v1383_v35  ;;  %v741_v42 = vadd.f32 %v740_v38, %v4232_v30  ;;  %v1094_v43 = vadd.f32 %v1093_v39, %v4235_v31 }
 0x18b   :  { %v1384_v44 = vmax.f32 %v739_v36, 0.0  ;;  %v1386_v45 = vmax.f32 %v1092_v37, 0.0  ;;  %v742_v46 = vpop.f32.mrf.mxu0  ;;  %v1095_v47 = vpop.f32.mrf.mxu1 }
 0x18c   :  { %v1385_v50 = vmax.f32 %v741_v42, 0.0  ;;  %v1387_v51 = vmax.f32 %v1094_v43, 0.0  ;;  %v743_v52 = vadd.f32 %v742_v46, %v4226_v26  ;;  %v1096_v53 = vadd.f32 %v1095_v47, %v4229_v27 }
 0x18d   :  { %v1561_v56 = vadd.f32 %v1560_v33, %v1384_v44  ;;  %v1635_v57 = vadd.f32 %v1634_v0, %v1386_v45  ;;  %v744_v58 = vpop.f32.mrf.mxu0  ;;  %v1097_v59 = vpop.f32.mrf.mxu1 }
 0x18e   :  { %v1598_v60 = vadd.f32 %v1597_v40, %v1385_v50  ;;  %v1672_v61 = vadd.f32 %v1671_v41, %v1387_v51  ;;  %v1388_v62 = vmax.f32 %v743_v52, 0.0  ;;  %v1390_v63 = vmax.f32 %v1096_v53, 0.0 }
 0x18f   :  { %v745_v1 = vadd.f32 %v744_v58, %v4232_v30  ;;  %v1098_v2 = vadd.f32 %v1097_v59, %v4235_v31  ;;  %v748_v3 = vpop.f32.mrf.mxu0  ;;  %v1101_v4 = vpop.f32.mrf.mxu1 }
 0x190   :  { %v1562_v5 = vadd.f32 %v1561_v56, %v1388_v62  ;;  %v1636_v6 = vadd.f32 %v1635_v57, %v1390_v63  ;;  %v749_v7 = vadd.f32 %v748_v3, %v4226_v26  ;;  %v1102_v8 = vadd.f32 %v1101_v4, %v4229_v27  ;;  %v3809_v62 = vld [vmem:[#allocation9 + $0x144] ss:$16 sps:$4 sm:$0xff]   ;;  %v3810_v63 = vld [vmem:[#allocation9 + $0x340] ss:$16 sps:$4 sm:$0xff]  }
 0x191   :  { %v1389_v9 = vmax.f32 %v745_v1, 0.0  ;;  %v1391_v10 = vmax.f32 %v1098_v2, 0.0  ;;  %v750_v11 = vpop.f32.mrf.mxu0  ;;  %v1103_v12 = vpop.f32.mrf.mxu1  ;;  %2721 = vmatprep.subr.bf16.mxu0 %v3809_v62 }
 0x192   :  { %v1392_v13 = vmax.f32 %v749_v7, 0.0  ;;  %v1394_v14 = vmax.f32 %v1102_v8, 0.0  ;;  %v751_v16 = vadd.f32 %v750_v11, %v4232_v30  ;;  %v1104_v19 = vadd.f32 %v1103_v12, %v4235_v31 }
 0x193   :  { %v1599_v20 = vadd.f32 %v1598_v60, %v1389_v9  ;;  %v1673_v21 = vadd.f32 %v1672_v61, %v1391_v10  ;;  %v752_v22 = vpop.f32.mrf.mxu0  ;;  %v1105_v25 = vpop.f32.mrf.mxu1  ;;  %v3807_v61 = vld [vmem:[#allocation9 + $0x140] ss:$16 sps:$4 sm:$0xff]  }
 0x194   :  { %v1563_v28 = vadd.f32 %v1562_v5, %v1392_v13  ;;  %v1637_v29 = vadd.f32 %v1636_v6, %v1394_v14  ;;  %v1393_v32 = vmax.f32 %v751_v16, 0.0  ;;  %v1395_v33 = vmax.f32 %v1104_v19, 0.0  ;;  %v3812_v5 = vld [vmem:[#allocation9 + $0x344] ss:$16 sps:$4 sm:$0xff]   ;;  %2722 = vmatpush2.bf16.msra.mxu0 %v3807_v61 }
 0x195   :  { %v753_v0 = vadd.f32 %v752_v22, %v4226_v26  ;;  %v1106_v34 = vadd.f32 %v1105_v25, %v4229_v27  ;;  %v754_v35 = vpop.f32.mrf.mxu0  ;;  %v1107_v36 = vpop.f32.mrf.mxu1  ;;  %2762 = vmatprep.subr.bf16.mxu1 %v3812_v5 }
 0x196   :  { %v1600_v37 = vadd.f32 %v1599_v20, %v1393_v32  ;;  %v1674_v38 = vadd.f32 %v1673_v21, %v1395_v33  ;;  %v755_v39 = vadd.f32 %v754_v35, %v4232_v30  ;;  %v1108_v40 = vadd.f32 %v1107_v36, %v4235_v31  ;;  %2763 = vmatpush2.bf16.msra.mxu1 %v3810_v63 }
 0x197   :  { %v1396_v41 = vmax.f32 %v753_v0, 0.0  ;;  %v1398_v42 = vmax.f32 %v1106_v34, 0.0  ;;  %v758_v43 = vpop.f32.mrf.mxu0  ;;  %v1111_v44 = vpop.f32.mrf.mxu1 }
 0x198   :  { %v1397_v45 = vmax.f32 %v755_v39, 0.0  ;;  %v1399_v46 = vmax.f32 %v1108_v40, 0.0  ;;  %v759_v47 = vadd.f32 %v758_v43, %v4226_v26  ;;  %v1112_v48 = vadd.f32 %v1111_v44, %v4229_v27 }
 0x199   :  { %v1564_v49 = vadd.f32 %v1563_v28, %v1396_v41  ;;  %v1638_v50 = vadd.f32 %v1637_v29, %v1398_v42  ;;  %v760_v51 = vpop.f32.mrf.mxu0  ;;  %v1113_v52 = vpop.f32.mrf.mxu1  ;;  %v4099_v42 = vmov 1983009808  }
 0x19a   :  { %v1601_v53 = vadd.f32 %v1600_v37, %v1397_v45  ;;  %v1675_v54 = vadd.f32 %v1674_v38, %v1399_v46  ;;  %v1400_v55 = vmax.f32 %v759_v47, 0.0  ;;  %v1402_v56 = vmax.f32 %v1112_v48, 0.0 }
 0x19b   :  { %v761_v57 = vadd.f32 %v760_v51, %v4232_v30  ;;  %v1114_v58 = vadd.f32 %v1113_v52, %v4235_v31  ;;  %v762_v59 = vpop.f32.mrf.mxu0  ;;  %v1115_v60 = vpop.f32.mrf.mxu1  ;;  %v1850_v43 = vunpack.c.l.s4 %v4099_v42  ;;  %v3818_v42 = vld [vmem:[#allocation9 + $0x324] ss:$16 sps:$4 sm:$0xff]  }
 0x19c   :  { %v1565_v1 = vadd.f32 %v1564_v49, %v1400_v55  ;;  %v1639_v2 = vadd.f32 %v1638_v50, %v1402_v56  ;;  %v763_v3 = vadd.f32 %v762_v59, %v4226_v26  ;;  %v1116_v4 = vadd.f32 %v1115_v60, %v4229_v27  ;;  %2764 = vmatprep.subr.bf16.mxu1 %v3818_v42 }
 0x19d   :  { %v1401_v6 = vmax.f32 %v761_v57, 0.0  ;;  %v1403_v7 = vmax.f32 %v1114_v58, 0.0  ;;  %v764_v8 = vpop.f32.mrf.mxu0  ;;  %v1117_v9 = vpop.f32.mrf.mxu1  ;;  %v1851_v56 = vunpack.c.0.s8 %v1850_v43 }
 0x19e   :  { %v1404_v10 = vmax.f32 %v763_v3, 0.0  ;;  %v1406_v11 = vmax.f32 %v1116_v4, 0.0  ;;  %v765_v12 = vadd.f32 %v764_v8, %v4232_v30  ;;  %v1118_v13 = vadd.f32 %v1117_v9, %v4235_v31 }
 0x19f   :  { %v1602_v14 = vadd.f32 %v1601_v53, %v1401_v6  ;;  %v1676_v16 = vadd.f32 %v1675_v54, %v1403_v7  ;;  %v4379_v19 = vpop.f32.mrf.mxu0  ;;  %v4381_v20 = vpop.f32.mrf.mxu1  ;;  %v4408_v4 = vsub.s32 %v1851_v56, %v4209_v15 }
 0x1a0   :  { %v1566_v21 = vadd.f32 %v1565_v1, %v1404_v10  ;;  %v1640_v22 = vadd.f32 %v1639_v2, %v1406_v11  ;;  %v1405_v25 = vmax.f32 %v765_v12, 0.0  ;;  %v1407_v28 = vmax.f32 %v1118_v13, 0.0 }
 0x1a1   :  { %v4383_v29 = vpop.f32.mrf.mxu0  ;;  %v4385_v32 = vpop.f32.mrf.mxu1 }
 0x1a2   :  { %v1567_v33 = vrot.slane %v1566_v21, 4  ;;  %v1641_v0 = vrot.slane %v1640_v22, 4  ;;  %v1603_v34 = vadd.f32 %v1602_v14, %v1405_v25  ;;  %v1677_v35 = vadd.f32 %v1676_v16, %v1407_v28 }
 0x1a3   :  { %v4387_v36 = vpop.f32.mrf.mxu0  ;;  %v4389_v37 = vpop.f32.mrf.mxu1 }
 0x1a4   :  { %v1568_v38 = vadd.f32 %v1567_v33, %v1566_v21  ;;  %v1642_v39 = vadd.f32 %v1641_v0, %v1640_v22  ;;  %v1604_v40 = vrot.slane %v1603_v34, 4  ;;  %v1678_v41 = vrot.slane %v1677_v35, 4 }
 0x1a5   :  { %v4391_v44 = vpop.f32.mrf.mxu0  ;;  %v4393_v45 = vpop.f32.mrf.mxu1 }
 0x1a6   :  { %v1569_v46 = vrot.slane %v1568_v38, 2  ;;  %v1643_v47 = vrot.slane %v1642_v39, 2  ;;  %v1605_v48 = vadd.f32 %v1604_v40, %v1603_v34  ;;  %v1679_v49 = vadd.f32 %v1678_v41, %v1677_v35  ;;  %v3815_v40 = vld [vmem:[#allocation9 + $0x124] ss:$16 sps:$4 sm:$0xff]   ;;  %v3816_v41 = vld [vmem:[#allocation9 + $0x320] ss:$16 sps:$4 sm:$0xff]  }
 0x1a7   :  { %v4395_v50 = vpop.f32.mrf.mxu0  ;;  %v4397_v51 = vpop.f32.mrf.mxu1  ;;  %2723 = vmatprep.subr.bf16.mxu0 %v3815_v40  ;;  %2765 = vmatpush2.bf16.msra.mxu1 %v3816_v41  ;;  %v3827_v41 = vld [vmem:[#allocation9 + $0xec] ss:$16 sps:$4 sm:$0xff]  }
 0x1a8   :  { %v1570_v52 = vadd.f32 %v1569_v46, %v1568_v38  ;;  %v1644_v53 = vadd.f32 %v1643_v47, %v1642_v39  ;;  %v1606_v54 = vrot.slane %v1605_v48, 2  ;;  %v1680_v55 = vrot.slane %v1679_v49, 2  ;;  %v3813_v39 = vld [vmem:[#allocation9 + $0x120] ss:$16 sps:$4 sm:$0xff]   ;;  %v3821_v47 = vld [vmem:[#allocation9 + $0x104] ss:$16 sps:$4 sm:$0xff]  }
 0x1a9   :  { %v4399_v57 = vpop.f32.mrf.mxu0  ;;  %v4401_v58 = vpop.f32.mrf.mxu1  ;;  %2724 = vmatpush2.bf16.msra.mxu0 %v3813_v39 }
 0x1aa   :  { %v1571_v59 = vrot.slane %v1570_v52, 1  ;;  %v1645_v60 = vrot.slane %v1644_v53, 1  ;;  %v1607_v61 = vadd.f32 %v1606_v54, %v1605_v48  ;;  %v1681_v62 = vadd.f32 %v1680_v55, %v1679_v49  ;;  %v3819_v48 = vld [vmem:[#allocation9 + $0x100] ss:$16 sps:$4 sm:$0xff]   ;;  %v3824_v49 = vld [vmem:[#allocation9 + $0x304] ss:$16 sps:$4 sm:$0xff]   ;;  %2725 = vmatprep.subr.bf16.mxu0 %v3821_v47 }
 0x1ab   :  { %v4403_v63 = vpop.f32.mrf.mxu0  ;;  %v4405_v1 = vpop.f32.mrf.mxu1  ;;  %v3822_v54 = vld [vmem:[#allocation9 + $0x300] ss:$16 sps:$4 sm:$0xff]   ;;  %2766 = vmatprep.subr.bf16.mxu1 %v3824_v49 }
 0x1ac   :  { %v1608_v2 = vrot.slane %v1607_v61, 1  ;;  %v1682_v3 = vrot.slane %v1681_v62, 1  ;;  %v1572_v7 = vadd.f32 %v1571_v59, %v1570_v52  ;;  %v1646_v8 = vadd.f32 %v1645_v60, %v1644_v53  ;;  %2767 = vmatpush2.bf16.msra.mxu1 %v3822_v54 }
 0x1ad   :  { %v4410_v5 = vpop.f32.mrf.mxu0  ;;  %v4412_v6 = vpop.f32.mrf.mxu1  ;;  %2726 = vmatpush2.bf16.msra.mxu0 %v3819_v48 }
 0x1ae   :  { %v1609_v9 = vadd.f32 %v1608_v2, %v1607_v61  ;;  %v1683_v10 = vadd.f32 %v1682_v3, %v1681_v62  ;;  %v773_v61 = vadd.f32 %v4387_v36, %v4226_v26  ;;  %v1126_v62 = vadd.f32 %v4389_v37, %v4229_v27  ;;  %2777 = vmatprep.subr.bf16.mxu0 %v3827_v41 }
 0x1af   :  { %v4414_v11 = vpop.f32.mrf.mxu0  ;;  %v4416_v12 = vpop.f32.mrf.mxu1  ;;  %v771_v37 = vadd.f32 %v4383_v29, %v4232_v30  ;;  %v781_v29 = vadd.f32 %v4399_v57, %v4232_v30 }
 0x1b0   :  { %v1847_v13 = vcombine.low %v1572_v7, %v1609_v9  ;;  %v1848_v14 = vcombine.low %v1646_v8, %v1683_v10  ;;  %v775_v7 = vadd.f32 %v4391_v44, %v4232_v30  ;;  %v769_v8 = vadd.f32 %v4379_v19, %v4226_v26 }
 0x1b1   :  { %v4418_v16 = vpop.f32.mrf.mxu0  ;;  %v4420_v21 = vpop.f32.mrf.mxu1  ;;  %v1122_v9 = vadd.f32 %v4381_v20, %v4229_v27  ;;  %v1128_v10 = vadd.f32 %v4393_v45, %v4235_v31  ;;  %v779_v44 = vadd.f32 %v4395_v50, %v4226_v26  ;;  %v1412_v19 = vmax.f32 %v773_v61, 0.0 }
 0x1b2   :  { %v4423_v15 = vrot.slane %v1847_v13, %v4408_v4  ;;  %v4426_v22 = vrot.slane %v1848_v14, %v4408_v4  ;;  %v1124_v14 = vadd.f32 %v4385_v32, %v4235_v31  ;;  %v1414_v39 = vmax.f32 %v1126_v62, 0.0  ;;  %v3830_v62 = vld [vmem:[#allocation9 + $0x2ec] ss:$16 sps:$4 sm:$0xff]  }
 0x1b3   :  { %v4428_v25 = vpop.f32.mrf.mxu0  ;;  %v4430_v28 = vpop.f32.mrf.mxu1  ;;  %v1132_v20 = vadd.f32 %v4397_v51, %v4229_v27  ;;  %v1413_v42 = vmax.f32 %v775_v7, 0.0  ;;  %v1134_v32 = vadd.f32 %v4401_v58, %v4235_v31  ;;  %v783_v50 = vadd.f32 %v4403_v63, %v4226_v26  ;;  %2818 = vmatprep.subr.bf16.mxu1 %v3830_v62 }
 0x1b4   :  { %v1408_v47 = vmax.f32 %v769_v8, 0.0  ;;  %v1410_v48 = vmax.f32 %v1122_v9, 0.0  ;;  %v1415_v49 = vmax.f32 %v1128_v10, 0.0  ;;  %v1136_v51 = vadd.f32 %v4405_v1, %v4229_v27 }
 0x1b5   :  { %v4434_v0 = vpop.f32.mrf.mxu0  ;;  %v4436_v34 = vpop.f32.mrf.mxu1  ;;  %v1409_v7 = vmax.f32 %v771_v37, 0.0  ;;  %v1411_v57 = vmax.f32 %v1124_v14, 0.0  ;;  %v1416_v33 = vmax.f32 %v779_v44, 0.0  ;;  %v785_v58 = vadd.f32 %v4410_v5, %v4232_v30 }
 0x1b6   :  { %v1684_v24 = vadd.f32 %v1412_v19, %v1408_v47  ;;  %v1758_v63 = vadd.f32 %v1414_v39, %v1410_v48  ;;  %v1418_v8 = vmax.f32 %v1132_v20, 0.0  ;;  %v1138_v9 = vadd.f32 %v4412_v6, %v4235_v31 }
 0x1b7   :  { %v4438_v35 = vpop.f32.mrf.mxu0  ;;  %v4440_v38 = vpop.f32.mrf.mxu1  ;;  %v1721_v18 = vadd.f32 %v1413_v42, %v1409_v7  ;;  %v1417_v41 = vmax.f32 %v781_v29, 0.0  ;;  %v1419_v23 = vmax.f32 %v1134_v32, 0.0  ;;  %v1420_v37 = vmax.f32 %v783_v50, 0.0 }
 0x1b8   :  { %v1795_v14 = vadd.f32 %v1415_v49, %v1411_v57  ;;  %v1422_v44 = vmax.f32 %v1136_v51, 0.0  ;;  %v789_v5 = vadd.f32 %v4414_v11, %v4226_v26  ;;  %v1142_v19 = vadd.f32 %v4416_v12, %v4229_v27 }
 0x1b9   :  { %v4442_v43 = vpop.f32.mrf.mxu0  ;;  %v4444_v46 = vpop.f32.mrf.mxu1  ;;  %v1685_v20 = vadd.f32 %v1684_v24, %v1416_v33  ;;  %v1421_v47 = vmax.f32 %v785_v58, 0.0  ;;  %v791_v42 = vadd.f32 %v4418_v16, %v4232_v30  ;;  %v1144_v29 = vadd.f32 %v4420_v21, %v4235_v31 }
 0x1ba   :  { %v1759_v32 = vadd.f32 %v1758_v63, %v1418_v8  ;;  %v1423_v50 = vmax.f32 %v1138_v9, 0.0  ;;  %v793_v11 = vadd.f32 %v4428_v25, %v4226_v26  ;;  %v1146_v12 = vadd.f32 %v4430_v28, %v4229_v27 }
 0x1bb   :  { %v4446_v52 = vpop.f32.mrf.mxu0  ;;  %v4448_v53 = vpop.f32.mrf.mxu1  ;;  %v1722_v24 = vadd.f32 %v1721_v18, %v1417_v41  ;;  %v1796_v33 = vadd.f32 %v1795_v14, %v1419_v23  ;;  %v1686_v51 = vadd.f32 %v1685_v20, %v1420_v37  ;;  %v795_v16 = vadd.f32 %v4434_v0, %v4232_v30 }
 0x1bc   :  { %v1760_v62 = vadd.f32 %v1759_v32, %v1422_v44  ;;  %v1424_v21 = vmax.f32 %v789_v5, 0.0  ;;  %v1426_v7 = vmax.f32 %v1142_v19, 0.0  ;;  %v1148_v57 = vadd.f32 %v4436_v34, %v4235_v31 }
 0x1bd   :  { %v4450_v55 = vpop.f32.mrf.mxu0  ;;  %v4452_v56 = vpop.f32.mrf.mxu1  ;;  %v1723_v28 = vadd.f32 %v1722_v24, %v1421_v47  ;;  %v1425_v63 = vmax.f32 %v791_v42, 0.0  ;;  %v1427_v8 = vmax.f32 %v1144_v29, 0.0  ;;  %v799_v18 = vadd.f32 %v4438_v35, %v4226_v26 }
 0x1be   :  { %v1797_v23 = vadd.f32 %v1796_v33, %v1423_v50  ;;  %v1428_v9 = vmax.f32 %v793_v11, 0.0  ;;  %v1430_v41 = vmax.f32 %v1146_v12, 0.0  ;;  %v1152_v0 = vadd.f32 %v4440_v38, %v4229_v27 }
 0x1bf   :  { %v4454_v59 = vpop.f32.mrf.mxu0  ;;  %v4456_v60 = vpop.f32.mrf.mxu1  ;;  %v1429_v34 = vmax.f32 %v795_v16, 0.0  ;;  %v801_v44 = vadd.f32 %v4442_v43, %v4232_v30  ;;  %v1154_v5 = vadd.f32 %v4444_v46, %v4235_v31  ;;  %v803_v35 = vadd.f32 %v4446_v52, %v4226_v26 }
 0x1c0   :  { %v1687_v19 = vadd.f32 %v1686_v51, %v1424_v21  ;;  %v1761_v20 = vadd.f32 %v1760_v62, %v1426_v7  ;;  %v1431_v47 = vmax.f32 %v1148_v57, 0.0  ;;  %v1156_v38 = vadd.f32 %v4448_v53, %v4229_v27 }
 0x1c1   :  { %v4462_v2 = vpop.f32.mrf.mxu0  ;;  %v4464_v3 = vpop.f32.mrf.mxu1  ;;  %v1724_v32 = vadd.f32 %v1723_v28, %v1425_v63  ;;  %v1798_v50 = vadd.f32 %v1797_v23, %v1427_v8  ;;  %v1432_v11 = vmax.f32 %v799_v18, 0.0  ;;  %v805_v43 = vadd.f32 %v4450_v55, %v4232_v30 }
 0x1c2   :  { %v1688_v46 = vadd.f32 %v1687_v19, %v1428_v9  ;;  %v1762_v12 = vadd.f32 %v1761_v20, %v1430_v41  ;;  %v1434_v24 = vmax.f32 %v1152_v0, 0.0  ;;  %v1158_v52 = vadd.f32 %v4452_v56, %v4235_v31 }
 0x1c3   :  { %v4474_v36 = vpop.f32.mrf.mxu0  ;;  %v4476_v13 = vpop.f32.mrf.mxu1  ;;  %v1725_v53 = vadd.f32 %v1724_v32, %v1429_v34  ;;  %v1433_v16 = vmax.f32 %v801_v44, 0.0  ;;  %v1435_v62 = vmax.f32 %v1154_v5, 0.0  ;;  %v1436_v21 = vmax.f32 %v803_v35, 0.0 }
 0x1c4   :  { %v1799_v7 = vadd.f32 %v1798_v50, %v1431_v47  ;;  %v1438_v57 = vmax.f32 %v1156_v38, 0.0  ;;  %v809_v28 = vadd.f32 %v4454_v59, %v4226_v26  ;;  %v1162_v55 = vadd.f32 %v4456_v60, %v4229_v27 }
 0x1c5   :  { %v4486_v40 = vpop.f32.mrf.mxu0  ;;  %v4488_v45 = vpop.f32.mrf.mxu1  ;;  %v1689_v56 = vadd.f32 %v1688_v46, %v1432_v11  ;;  %v1437_v18 = vmax.f32 %v805_v43, 0.0  ;;  %v811_v23 = vadd.f32 %v4462_v2, %v4232_v30  ;;  %v1164_v9 = vadd.f32 %v4464_v3, %v4235_v31 }
 0x1c6   :  { %v1763_v41 = vadd.f32 %v1762_v12, %v1434_v24  ;;  %v1439_v0 = vmax.f32 %v1158_v52, 0.0  ;;  %v813_v59 = vadd.f32 %v4474_v36, %v4226_v26  ;;  %v1166_v60 = vadd.f32 %v4476_v13, %v4229_v27 }
 0x1c7   :  { %v4498_v54 = vpop.f32.mrf.mxu0  ;;  %v4500_v61 = vpop.f32.mrf.mxu1  ;;  %v1726_v5 = vadd.f32 %v1725_v53, %v1433_v16  ;;  %v1800_v35 = vadd.f32 %v1799_v7, %v1435_v62  ;;  %v1690_v19 = vadd.f32 %v1689_v56, %v1436_v21  ;;  %v815_v2 = vadd.f32 %v4486_v40, %v4232_v30 }
 0x1c8   :  { %v1764_v20 = vadd.f32 %v1763_v41, %v1438_v57  ;;  %v1440_v3 = vmax.f32 %v809_v28, 0.0  ;;  %v1442_v47 = vmax.f32 %v1162_v55, 0.0  ;;  %v1168_v38 = vadd.f32 %v4488_v45, %v4235_v31 }
 0x1c9   :  { %v4506_v10 = vpop.f32.mrf.mxu0  ;;  %v4508_v1 = vpop.f32.mrf.mxu1  ;;  %v1727_v13 = vadd.f32 %v1726_v5, %v1437_v18  ;;  %v1441_v50 = vmax.f32 %v811_v23, 0.0  ;;  %v1443_v11 = vmax.f32 %v1164_v9, 0.0  ;;  %v819_v43 = vadd.f32 %v4498_v54, %v4226_v26 }
 0x1ca   :  { %v1801_v46 = vadd.f32 %v1800_v35, %v1439_v0  ;;  %v1444_v12 = vmax.f32 %v813_v59, 0.0  ;;  %v1446_v24 = vmax.f32 %v1166_v60, 0.0  ;;  %v1172_v40 = vadd.f32 %v4500_v61, %v4229_v27 }
 0x1cb   :  { %v4514_v39 = vpop.f32.mrf.mxu0  ;;  %v4516_v6 = vpop.f32.mrf.mxu1  ;;  %v1445_v45 = vmax.f32 %v815_v2, 0.0  ;;  %v821_v16 = vadd.f32 %v4506_v10, %v4232_v30  ;;  %v1174_v62 = vadd.f32 %v4508_v1, %v4235_v31  ;;  %v1691_v21 = vadd.f32 %v1690_v19, %v1440_v3 }
 0x1cc   :  { %v823_v54 = vadd.f32 %v4514_v39, %v4226_v26  ;;  %v1765_v7 = vadd.f32 %v1764_v20, %v1442_v47  ;;  %v1447_v57 = vmax.f32 %v1168_v38, 0.0  ;;  %v1176_v61 = vadd.f32 %v4516_v6, %v4229_v27 }
 0x1cd   :  { %v4526_v48 = vpop.f32.mrf.mxu0  ;;  %v4528_v49 = vpop.f32.mrf.mxu1  ;;  %v1728_v56 = vadd.f32 %v1727_v13, %v1441_v50  ;;  %v1802_v18 = vadd.f32 %v1801_v46, %v1443_v11  ;;  %v1448_v23 = vmax.f32 %v819_v43, 0.0  ;;  %v1692_v1 = vadd.f32 %v1691_v21, %v1444_v12 }
 0x1ce   :  { %v825_v10 = vadd.f32 %v4526_v48, %v4232_v30  ;;  %v1766_v9 = vadd.f32 %v1765_v7, %v1446_v24  ;;  %v1450_v41 = vmax.f32 %v1172_v40, 0.0  ;;  %v1178_v39 = vadd.f32 %v4528_v49, %v4235_v31 }
 0x1cf   :  { %v4534_v25 = vpop.f32.mrf.mxu0  ;;  %v4536_v58 = vpop.f32.mrf.mxu1  ;;  %v1729_v6 = vadd.f32 %v1728_v56, %v1445_v45  ;;  %v1449_v60 = vmax.f32 %v821_v16, 0.0  ;;  %v1451_v5 = vmax.f32 %v1174_v62, 0.0  ;;  %v1452_v35 = vmax.f32 %v823_v54, 0.0 }
 0x1d0   :  { %v1803_v19 = vadd.f32 %v1802_v18, %v1447_v57  ;;  %v1454_v2 = vmax.f32 %v1176_v61, 0.0  ;;  %v829_v20 = vadd.f32 %v4534_v25, %v4226_v26  ;;  %v1182_v48 = vadd.f32 %v4536_v58, %v4229_v27 }
 0x1d1   :  { %v4542_v37 = vpop.f32.mrf.mxu0  ;;  %v4544_v14 = vpop.f32.mrf.mxu1  ;;  %v1693_v49 = vadd.f32 %v1692_v1, %v1448_v23  ;;  %v1453_v38 = vmax.f32 %v825_v10, 0.0  ;;  %v1767_v11 = vadd.f32 %v1766_v9, %v1450_v41  ;;  %v1455_v43 = vmax.f32 %v1178_v39, 0.0 }
 0x1d2   :  { %v831_v13 = vadd.f32 %v4542_v37, %v4232_v30  ;;  %v1184_v50 = vadd.f32 %v4544_v14, %v4235_v31  ;;  %v1730_v24 = vadd.f32 %v1729_v6, %v1449_v60  ;;  %v1804_v40 = vadd.f32 %v1803_v19, %v1451_v5 }
 0x1d3   :  { %v4554_v42 = vpop.f32.mrf.mxu0  ;;  %v4556_v29 = vpop.f32.mrf.mxu1  ;;  %v1694_v45 = vadd.f32 %v1693_v49, %v1452_v35  ;;  %v1768_v16 = vadd.f32 %v1767_v11, %v1454_v2  ;;  %v1456_v14 = vmax.f32 %v829_v20, 0.0  ;;  %v1458_v62 = vmax.f32 %v1182_v48, 0.0 }
 0x1d4   :  { %v833_v25 = vadd.f32 %v4554_v42, %v4226_v26  ;;  %v1186_v58 = vadd.f32 %v4556_v29, %v4229_v27  ;;  %v1731_v29 = vadd.f32 %v1730_v24, %v1453_v38  ;;  %v1457_v7 = vmax.f32 %v831_v13, 0.0 }
 0x1d5   :  { %v4562_v33 = vpop.f32.mrf.mxu0  ;;  %v4564_v51 = vpop.f32.mrf.mxu1  ;;  %v1459_v57 = vmax.f32 %v1184_v50, 0.0  ;;  %v1805_v56 = vadd.f32 %v1804_v40, %v1455_v43  ;;  %v1695_v39 = vadd.f32 %v1694_v45, %v1456_v14  ;;  %v1769_v6 = vadd.f32 %v1768_v16, %v1458_v62 }
 0x1d6   :  { %v835_v37 = vadd.f32 %v4562_v33, %v4232_v30  ;;  %v1188_v54 = vadd.f32 %v4564_v51, %v4235_v31  ;;  %v1460_v18 = vmax.f32 %v833_v25, 0.0  ;;  %v1462_v23 = vmax.f32 %v1186_v58, 0.0 }
 0x1d7   :  { %v4570_v63 = vpop.f32.mrf.mxu0  ;;  %v4572_v8 = vpop.f32.mrf.mxu1  ;;  %v1732_v19 = vadd.f32 %v1731_v29, %v1457_v7  ;;  %v1806_v2 = vadd.f32 %v1805_v56, %v1459_v57 }
 0x1d8   :  { %v839_v61 = vadd.f32 %v4570_v63, %v4226_v26  ;;  %v1192_v33 = vadd.f32 %v4572_v8, %v4229_v27  ;;  %v1461_v51 = vmax.f32 %v835_v37, 0.0  ;;  %v1463_v60 = vmax.f32 %v1188_v54, 0.0 }
 0x1d9   :  { %v4582_v34 = vpop.f32.mrf.mxu0  ;;  %v4584_v44 = vpop.f32.mrf.mxu1  ;;  %v1696_v48 = vadd.f32 %v1695_v39, %v1460_v18  ;;  %v1770_v49 = vadd.f32 %v1769_v6, %v1462_v23 }
 0x1da   :  { %v841_v9 = vadd.f32 %v4582_v34, %v4232_v30  ;;  %v1194_v41 = vadd.f32 %v4584_v44, %v4235_v31  ;;  %v1464_v20 = vmax.f32 %v839_v61, 0.0  ;;  %v1466_v44 = vmax.f32 %v1192_v33, 0.0 }
 0x1db   :  { %v4590_v36 = vpop.f32.mrf.mxu0  ;;  %v4592_v32 = vpop.f32.mrf.mxu1  ;;  %v1733_v50 = vadd.f32 %v1732_v19, %v1461_v51  ;;  %v1807_v25 = vadd.f32 %v1806_v2, %v1463_v60 }
 0x1dc   :  { %v843_v63 = vadd.f32 %v4590_v36, %v4226_v26  ;;  %v1196_v8 = vadd.f32 %v4592_v32, %v4229_v27  ;;  %v1465_v11 = vmax.f32 %v841_v9, 0.0  ;;  %v1467_v43 = vmax.f32 %v1194_v41, 0.0 }
 0x1dd   :  { %v4598_v52 = vpop.f32.mrf.mxu0  ;;  %v4600_v53 = vpop.f32.mrf.mxu1  ;;  %v1697_v37 = vadd.f32 %v1696_v48, %v1464_v20  ;;  %v1771_v62 = vadd.f32 %v1770_v49, %v1466_v44 }
 0x1de   :  { %v845_v34 = vadd.f32 %v4598_v52, %v4232_v30  ;;  %v1198_v36 = vadd.f32 %v4600_v53, %v4235_v31  ;;  %v1468_v32 = vmax.f32 %v843_v63, 0.0  ;;  %v1470_v58 = vmax.f32 %v1196_v8, 0.0 }
 0x1df   :  { %v4610_v28 = vpop.f32.mrf.mxu0  ;;  %v4612_v55 = vpop.f32.mrf.mxu1  ;;  %v1734_v57 = vadd.f32 %v1733_v50, %v1465_v11  ;;  %v1808_v61 = vadd.f32 %v1807_v25, %v1467_v43 }
 0x1e0   :  { %v849_v24 = vadd.f32 %v4610_v28, %v4226_v26  ;;  %v1202_v52 = vadd.f32 %v4612_v55, %v4229_v27  ;;  %v1469_v16 = vmax.f32 %v845_v34, 0.0  ;;  %v1471_v54 = vmax.f32 %v1198_v36, 0.0 }
 0x1e1   :  { %v4618_v0 = vpop.f32.mrf.mxu0  ;;  %v4620_v59 = vpop.f32.mrf.mxu1  ;;  %v1698_v56 = vadd.f32 %v1697_v37, %v1468_v32 }
 0x1e2   :  { %v851_v53 = vadd.f32 %v4618_v0, %v4232_v30  ;;  %v1204_v14 = vadd.f32 %v4620_v59, %v4235_v31  ;;  %v1772_v0 = vadd.f32 %v1771_v62, %v1470_v58  ;;  %v1472_v23 = vmax.f32 %v849_v24, 0.0 }
 0x1e3   :  { %v4626_v3 = vpop.f32.mrf.mxu0  ;;  %v4628_v47 = vpop.f32.mrf.mxu1  ;;  %v1474_v33 = vmax.f32 %v1202_v52, 0.0  ;;  %v1809_v39 = vadd.f32 %v1808_v61, %v1471_v54 }
 0x1e4   :  { %v853_v29 = vadd.f32 %v4626_v3, %v4226_v26  ;;  %v1206_v28 = vadd.f32 %v4628_v47, %v4229_v27  ;;  %v1735_v3 = vadd.f32 %v1734_v57, %v1469_v16  ;;  %v1473_v41 = vmax.f32 %v851_v53, 0.0 }
 0x1e5   :  { %v4638_v46 = vpop.f32.mrf.mxu0  ;;  %v4640_v12 = vpop.f32.mrf.mxu1  ;;  %v1475_v63 = vmax.f32 %v1204_v14, 0.0  ;;  %v1699_v48 = vadd.f32 %v1698_v56, %v1472_v23  ;;  %v1773_v49 = vadd.f32 %v1772_v0, %v1474_v33 }
 0x1e6   :  { %v855_v18 = vadd.f32 %v4638_v46, %v4232_v30  ;;  %v1208_v59 = vadd.f32 %v4640_v12, %v4235_v31  ;;  %v1476_v6 = vmax.f32 %v853_v29, 0.0  ;;  %v1478_v60 = vmax.f32 %v1206_v28, 0.0 }
 0x1e7   :  { %v4646_v42 = vpop.f32.mrf.mxu0  ;;  %v4648_v21 = vpop.f32.mrf.mxu1  ;;  %v1736_v11 = vadd.f32 %v1735_v3, %v1473_v41 }
 0x1e8   :  { %v859_v47 = vadd.f32 %v4646_v42, %v4226_v26  ;;  %v1212_v46 = vadd.f32 %v4648_v21, %v4229_v27  ;;  %v1477_v2 = vmax.f32 %v855_v18, 0.0  ;;  %v1479_v42 = vmax.f32 %v1208_v59, 0.0 }
 0x1e9   :  { %v4654_v10 = vpop.f32.mrf.mxu0  ;;  %v4656_v1 = vpop.f32.mrf.mxu1  ;;  %v1810_v21 = vadd.f32 %v1809_v39, %v1475_v63  ;;  %v1700_v25 = vadd.f32 %v1699_v48, %v1476_v6  ;;  %v1774_v58 = vadd.f32 %v1773_v49, %v1478_v60 }
 0x1ea   :  { %v861_v12 = vadd.f32 %v4654_v10, %v4232_v30  ;;  %v1214_v20 = vadd.f32 %v4656_v1, %v4235_v31  ;;  %v1480_v43 = vmax.f32 %v859_v47, 0.0  ;;  %v1482_v10 = vmax.f32 %v1212_v46, 0.0 }
 0x1eb   :  { %v862_v5 = vpop.f32.mrf.mxu0  ;;  %v1215_v35 = vpop.f32.mrf.mxu1  ;;  %v1811_v14 = vadd.f32 %v1810_v21, %v1479_v42 }
 0x1ec   :  { %v863_v34 = vadd.f32 %v862_v5, %v4226_v26  ;;  %v1216_v44 = vadd.f32 %v1215_v35, %v4229_v27  ;;  %v1737_v5 = vadd.f32 %v1736_v11, %v1477_v2  ;;  %v1481_v37 = vmax.f32 %v861_v12, 0.0 }
 0x1ed   :  { %v864_v38 = vpop.f32.mrf.mxu0  ;;  %v1217_v13 = vpop.f32.mrf.mxu1  ;;  %v1483_v16 = vmax.f32 %v1214_v20, 0.0  ;;  %v1775_v56 = vadd.f32 %v1774_v58, %v1482_v10 }
 0x1ee   :  { %v865_v32 = vadd.f32 %v864_v38, %v4232_v30  ;;  %v1218_v24 = vadd.f32 %v1217_v13, %v4235_v31  ;;  %v1484_v53 = vmax.f32 %v863_v34, 0.0  ;;  %v1486_v35 = vmax.f32 %v1216_v44, 0.0 }
 0x1ef   :  { %v868_v40 = vpop.f32.mrf.mxu0  ;;  %v1221_v45 = vpop.f32.mrf.mxu1  ;;  %v1701_v38 = vadd.f32 %v1700_v25, %v1480_v43  ;;  %v1738_v3 = vadd.f32 %v1737_v5, %v1481_v37 }
 0x1f0   :  { %v869_v62 = vadd.f32 %v868_v40, %v4226_v26  ;;  %v1222_v54 = vadd.f32 %v1221_v45, %v4229_v27  ;;  %v1485_v57 = vmax.f32 %v865_v32, 0.0  ;;  %v1487_v18 = vmax.f32 %v1218_v24, 0.0 }
 0x1f1   :  { %v870_v7 = vpop.f32.mrf.mxu0  ;;  %v1223_v55 = vpop.f32.mrf.mxu1  ;;  %v1812_v40 = vadd.f32 %v1811_v14, %v1483_v16  ;;  %v1702_v41 = vadd.f32 %v1701_v38, %v1484_v53  ;;  %v1776_v63 = vadd.f32 %v1775_v56, %v1486_v35 }
 0x1f2   :  { %v871_v61 = vadd.f32 %v870_v7, %v4232_v30  ;;  %v1224_v13 = vadd.f32 %v1223_v55, %v4235_v31  ;;  %v1488_v47 = vmax.f32 %v869_v62, 0.0  ;;  %v1490_v39 = vmax.f32 %v1222_v54, 0.0 }
 0x1f3   :  { %v872_v51 = vpop.f32.mrf.mxu0  ;;  %v1225_v9 = vpop.f32.mrf.mxu1  ;;  %v1739_v60 = vadd.f32 %v1738_v3, %v1485_v57 }
 0x1f4   :  { %v873_v0 = vadd.f32 %v872_v51, %v4226_v26  ;;  %v1226_v23 = vadd.f32 %v1225_v9, %v4229_v27  ;;  %v1489_v46 = vmax.f32 %v871_v61, 0.0  ;;  %v1491_v2 = vmax.f32 %v1224_v13, 0.0 }
 0x1f5   :  { %v874_v8 = vpop.f32.mrf.mxu0  ;;  %v1227_v19 = vpop.f32.mrf.mxu1  ;;  %v1813_v9 = vadd.f32 %v1812_v40, %v1487_v18  ;;  %v1703_v11 = vadd.f32 %v1702_v41, %v1488_v47  ;;  %v1777_v21 = vadd.f32 %v1776_v63, %v1490_v39 }
 0x1f6   :  { %v875_v45 = vadd.f32 %v874_v8, %v4232_v30  ;;  %v1228_v7 = vadd.f32 %v1227_v19, %v4235_v31  ;;  %v1492_v12 = vmax.f32 %v873_v0, 0.0  ;;  %v1494_v20 = vmax.f32 %v1226_v23, 0.0 }
 0x1f7   :  { %v878_v36 = vpop.f32.mrf.mxu0  ;;  %v1231_v50 = vpop.f32.mrf.mxu1  ;;  %v1740_v58 = vadd.f32 %v1739_v60, %v1489_v46  ;;  %v1814_v10 = vadd.f32 %v1813_v9, %v1491_v2 }
 0x1f8   :  { %v879_v51 = vadd.f32 %v878_v36, %v4226_v26  ;;  %v1232_v34 = vadd.f32 %v1231_v50, %v4229_v27  ;;  %v1493_v8 = vmax.f32 %v875_v45, 0.0  ;;  %v1495_v43 = vmax.f32 %v1228_v7, 0.0 }
 0x1f9   :  { %v880_v1 = vpop.f32.mrf.mxu0  ;;  %v1233_v52 = vpop.f32.mrf.mxu1  ;;  %v1704_v5 = vadd.f32 %v1703_v11, %v1492_v12  ;;  %v1778_v37 = vadd.f32 %v1777_v21, %v1494_v20 }
 0x1fa   :  { %v881_v42 = vadd.f32 %v880_v1, %v4232_v30  ;;  %v1234_v44 = vadd.f32 %v1233_v52, %v4235_v31  ;;  %v1496_v24 = vmax.f32 %v879_v51, 0.0  ;;  %v1498_v16 = vmax.f32 %v1232_v34, 0.0 }
 0x1fb   :  { %v882_v29 = vpop.f32.mrf.mxu0  ;;  %v1235_v28 = vpop.f32.mrf.mxu1  ;;  %v1741_v14 = vadd.f32 %v1740_v58, %v1493_v8 }
 0x1fc   :  { %v883_v19 = vadd.f32 %v882_v29, %v4226_v26  ;;  %v1236_v32 = vadd.f32 %v1235_v28, %v4229_v27  ;;  %v1497_v35 = vmax.f32 %v881_v42, 0.0  ;;  %v1499_v62 = vmax.f32 %v1234_v44, 0.0 }
 0x1fd   :  { %v884_v33 = vpop.f32.mrf.mxu0  ;;  %v1237_v59 = vpop.f32.mrf.mxu1  ;;  %v1815_v29 = vadd.f32 %v1814_v10, %v1495_v43  ;;  %v1705_v56 = vadd.f32 %v1704_v5, %v1496_v24 }
 0x1fe   :  { %v885_v50 = vadd.f32 %v884_v33, %v4232_v30  ;;  %v1238_v1 = vadd.f32 %v1237_v59, %v4235_v31  ;;  %v1500_v54 = vmax.f32 %v883_v19, 0.0  ;;  %v1502_v28 = vmax.f32 %v1236_v32, 0.0 }
 0x1ff   :  { %v888_v6 = vpop.f32.mrf.mxu0  ;;  %v1241_v55 = vpop.f32.mrf.mxu1  ;;  %v1779_v33 = vadd.f32 %v1778_v37, %v1498_v16  ;;  %v1742_v63 = vadd.f32 %v1741_v14, %v1497_v35  ;;  %v1816_v47 = vadd.f32 %v1815_v29, %v1499_v62 }
 0x200   :  { %v889_v38 = vadd.f32 %v888_v6, %v4226_v26  ;;  %v1242_v57 = vadd.f32 %v1241_v55, %v4229_v27  ;;  %v1501_v18 = vmax.f32 %v885_v50, 0.0  ;;  %v1503_v59 = vmax.f32 %v1238_v1, 0.0 }
 0x201   :  { %v890_v48 = vpop.f32.mrf.mxu0  ;;  %v1243_v49 = vpop.f32.mrf.mxu1  ;;  %v1706_v39 = vadd.f32 %v1705_v56, %v1500_v54  ;;  %v1780_v6 = vadd.f32 %v1779_v33, %v1502_v28 }
 0x202   :  { %v891_v0 = vadd.f32 %v890_v48, %v4232_v30  ;;  %v1244_v23 = vadd.f32 %v1243_v49, %v4235_v31  ;;  %v1504_v55 = vmax.f32 %v889_v38, 0.0  ;;  %v1506_v60 = vmax.f32 %v1242_v57, 0.0 }
 0x203   :  { %v892_v36 = vpop.f32.mrf.mxu0  ;;  %v1245_v25 = vpop.f32.mrf.mxu1  ;;  %v1743_v9 = vadd.f32 %v1742_v63, %v1501_v18  ;;  %v1817_v48 = vadd.f32 %v1816_v47, %v1503_v59 }
 0x204   :  { %v893_v3 = vadd.f32 %v892_v36, %v4226_v26  ;;  %v1246_v40 = vadd.f32 %v1245_v25, %v4229_v27  ;;  %v1505_v12 = vmax.f32 %v891_v0, 0.0  ;;  %v1507_v20 = vmax.f32 %v1244_v23, 0.0 }
 0x205   :  { %v894_v52 = vpop.f32.mrf.mxu0  ;;  %v1247_v53 = vpop.f32.mrf.mxu1  ;;  %v1707_v36 = vadd.f32 %v1706_v39, %v1504_v55  ;;  %v1781_v25 = vadd.f32 %v1780_v6, %v1506_v60 }
 0x206   :  { %v895_v7 = vadd.f32 %v894_v52, %v4232_v30  ;;  %v1248_v46 = vadd.f32 %v1247_v53, %v4235_v31  ;;  %v1508_v49 = vmax.f32 %v893_v3, 0.0  ;;  %v1510_v8 = vmax.f32 %v1246_v40, 0.0 }
 0x207   :  { %v898_v61 = vpop.f32.mrf.mxu0  ;;  %v1251_v13 = vpop.f32.mrf.mxu1  ;;  %v1744_v5 = vadd.f32 %v1743_v9, %v1505_v12  ;;  %v1818_v37 = vadd.f32 %v1817_v48, %v1507_v20 }
 0x208   :  { %v899_v34 = vadd.f32 %v898_v61, %v4226_v26  ;;  %v1252_v42 = vadd.f32 %v1251_v13, %v4229_v27  ;;  %v1509_v11 = vmax.f32 %v895_v7, 0.0  ;;  %v1511_v58 = vmax.f32 %v1248_v46, 0.0 }
 0x209   :  { %v900_v41 = vpop.f32.mrf.mxu0  ;;  %v1253_v45 = vpop.f32.mrf.mxu1  ;;  %v1708_v52 = vadd.f32 %v1707_v36, %v1508_v49  ;;  %v1782_v53 = vadd.f32 %v1781_v25, %v1510_v8 }
 0x20a   :  { %v901_v21 = vadd.f32 %v900_v41, %v4232_v30  ;;  %v1254_v43 = vadd.f32 %v1253_v45, %v4235_v31  ;;  %v1512_v16 = vmax.f32 %v899_v34, 0.0  ;;  %v1514_v14 = vmax.f32 %v1252_v42, 0.0 }
 0x20b   :  { %v902_v2 = vpop.f32.mrf.mxu0  ;;  %v1255_v51 = vpop.f32.mrf.mxu1  ;;  %v1745_v29 = vadd.f32 %v1744_v5, %v1509_v11  ;;  %v1819_v61 = vadd.f32 %v1818_v37, %v1511_v58 }
 0x20c   :  { %v903_v32 = vadd.f32 %v902_v2, %v4226_v26  ;;  %v1256_v10 = vadd.f32 %v1255_v51, %v4229_v27  ;;  %v1513_v28 = vmax.f32 %v901_v21, 0.0  ;;  %v1515_v38 = vmax.f32 %v1254_v43, 0.0 }
 0x20d   :  { %v904_v44 = vpop.f32.mrf.mxu0  ;;  %v1257_v19 = vpop.f32.mrf.mxu1  ;;  %v1709_v33 = vadd.f32 %v1708_v52, %v1512_v16  ;;  %v1783_v41 = vadd.f32 %v1782_v53, %v1514_v14 }
 0x20e   :  { %v905_v1 = vadd.f32 %v904_v44, %v4232_v30  ;;  %v1516_v57 = vmax.f32 %v903_v32, 0.0  ;;  %v1518_v13 = vmax.f32 %v1256_v10, 0.0  ;;  %v1258_v56 = vadd.f32 %v1257_v19, %v4235_v31 }
 0x20f   :  { %v908_v24 = vpop.f32.mrf.mxu0  ;;  %v1261_v50 = vpop.f32.mrf.mxu1  ;;  %v1746_v6 = vadd.f32 %v1745_v29, %v1513_v28  ;;  %v1820_v55 = vadd.f32 %v1819_v61, %v1515_v38 }
 0x210   :  { %v909_v35 = vadd.f32 %v908_v24, %v4226_v26  ;;  %v1262_v18 = vadd.f32 %v1261_v50, %v4229_v27  ;;  %v1517_v59 = vmax.f32 %v905_v1, 0.0  ;;  %v1710_v60 = vadd.f32 %v1709_v33, %v1516_v57 }
 0x211   :  { %v910_v62 = vpop.f32.mrf.mxu0  ;;  %v1263_v54 = vpop.f32.mrf.mxu1  ;;  %v1784_v2 = vadd.f32 %v1783_v41, %v1518_v13  ;;  %v1519_v51 = vmax.f32 %v1258_v56, 0.0 }
 0x212   :  { %v911_v3 = vadd.f32 %v910_v62, %v4232_v30  ;;  %v1520_v45 = vmax.f32 %v909_v35, 0.0  ;;  %v1264_v63 = vadd.f32 %v1263_v54, %v4235_v31  ;;  %v1522_v9 = vmax.f32 %v1262_v18, 0.0 }
 0x213   :  { %v912_v0 = vpop.f32.mrf.mxu0  ;;  %v1265_v23 = vpop.f32.mrf.mxu1  ;;  %v1747_v48 = vadd.f32 %v1746_v6, %v1517_v59  ;;  %v1821_v24 = vadd.f32 %v1820_v55, %v1519_v51 }
 0x214   :  { %v913_v40 = vadd.f32 %v912_v0, %v4226_v26  ;;  %v1266_v47 = vadd.f32 %v1265_v23, %v4229_v27  ;;  %v1521_v49 = vmax.f32 %v911_v3, 0.0  ;;  %v1711_v44 = vadd.f32 %v1710_v60, %v1520_v45 }
 0x215   :  { %v914_v39 = vpop.f32.mrf.mxu0  ;;  %v1267_v7 = vpop.f32.mrf.mxu1  ;;  %v1523_v19 = vmax.f32 %v1264_v63, 0.0  ;;  %v1785_v50 = vadd.f32 %v1784_v2, %v1522_v9 }
 0x216   :  { %v915_v46 = vadd.f32 %v914_v39, %v4232_v30  ;;  %v1268_v12 = vadd.f32 %v1267_v7, %v4235_v31  ;;  %v1524_v8 = vmax.f32 %v913_v40, 0.0  ;;  %v1526_v11 = vmax.f32 %v1266_v47, 0.0 }
 0x217   :  { %v918_v20 = vpop.f32.mrf.mxu0  ;;  %v1271_v34 = vpop.f32.mrf.mxu1  ;;  %v1748_v52 = vadd.f32 %v1747_v48, %v1521_v49  ;;  %v1822_v62 = vadd.f32 %v1821_v24, %v1523_v19 }
 0x218   :  { %v919_v42 = vadd.f32 %v918_v20, %v4226_v26  ;;  %v1272_v21 = vadd.f32 %v1271_v34, %v4229_v27  ;;  %v1525_v36 = vmax.f32 %v915_v46, 0.0  ;;  %v1527_v5 = vmax.f32 %v1268_v12, 0.0 }
 0x219   :  { %v920_v43 = vpop.f32.mrf.mxu0  ;;  %v1273_v32 = vpop.f32.mrf.mxu1  ;;  %v1712_v53 = vadd.f32 %v1711_v44, %v1524_v8  ;;  %v1786_v54 = vadd.f32 %v1785_v50, %v1526_v11 }
 0x21a   :  { %v1528_v25 = vmax.f32 %v919_v42, 0.0  ;;  %v921_v58 = vadd.f32 %v920_v43, %v4232_v30  ;;  %v1274_v10 = vadd.f32 %v1273_v32, %v4235_v31  ;;  %v1530_v37 = vmax.f32 %v1272_v21, 0.0 }
 0x21b   :  { %v922_v16 = vpop.f32.mrf.mxu0  ;;  %v1275_v1 = vpop.f32.mrf.mxu1  ;;  %v1749_v61 = vadd.f32 %v1748_v52, %v1525_v36  ;;  %v1823_v0 = vadd.f32 %v1822_v62, %v1527_v5  ;;  %v4819_v5 = vcombine.low %v4423_v15, %v4426_v22  ;;  %v3828_v15 = vld [vmem:[#allocation9 + $0x2e8] ss:$16 sps:$4 sm:$0xff]   ;;  %v3833_v22 = vld [vmem:[#allocation9 + $0xcc] ss:$16 sps:$4 sm:$0xff]  }
 0x21c   :  { %v1529_v14 = vmax.f32 %v921_v58, 0.0  ;;  %v923_v35 = vadd.f32 %v922_v16, %v4226_v26  ;;  %v1531_v29 = vmax.f32 %v1274_v10, 0.0  ;;  %v1276_v28 = vadd.f32 %v1275_v1, %v4229_v27 }
 0x21d   :  { %v924_v38 = vpop.f32.mrf.mxu0  ;;  %v1277_v57 = vpop.f32.mrf.mxu1  ;;  %v1713_v13 = vadd.f32 %v1712_v53, %v1528_v25  ;;  %v1787_v23 = vadd.f32 %v1786_v54, %v1530_v37 }
 0x21e   :  { %v1532_v56 = vmax.f32 %v923_v35, 0.0  ;;  %v925_v18 = vadd.f32 %v924_v38, %v4232_v30  ;;  %v1534_v33 = vmax.f32 %v1276_v28, 0.0  ;;  %v1278_v59 = vadd.f32 %v1277_v57, %v4235_v31  ;;  %v3825_v28 = vld [vmem:[#allocation9 + $0xe8] ss:$16 sps:$4 sm:$0xff]  }
 0x21f   :  { %v1750_v3 = vadd.f32 %v1749_v61, %v1529_v14  ;;  %v1824_v41 = vadd.f32 %v1823_v0, %v1531_v29  ;;  %v3834_v0 = vld [vmem:[#allocation9 + $0x2c8] ss:$16 sps:$4 sm:$0xff]  }
 0x220   :  { %v1714_v40 = vadd.f32 %v1713_v13, %v1532_v56  ;;  %v1533_v26 = vmax.f32 %v925_v18, 0.0  ;;  %v1788_v45 = vadd.f32 %v1787_v23, %v1534_v33  ;;  %v1535_v63 = vmax.f32 %v1278_v59, 0.0  ;;  %v3836_v56 = vld [vmem:[#allocation9 + $0x2cc] ss:$16 sps:$4 sm:$0xff]   ;;  %v3831_v18 = vld [vmem:[#allocation9 + $0xc8] ss:$16 sps:$4 sm:$0xff]  }
 0x221   :  { %v3842_v23 = vld [vmem:[#allocation9 + $0x2ac] ss:$16 sps:$4 sm:$0xff]   ;;  %v3837_v33 = vld [vmem:[#allocation9 + $0xa8] ss:$16 sps:$4 sm:$0xff]  }
 0x222   :  { %v1715_v47 = vrot.slane %v1714_v40, 4  ;;  %v1751_v27 = vadd.f32 %v1750_v3, %v1533_v26  ;;  %v1789_v39 = vrot.slane %v1788_v45, 4  ;;  %v1825_v7 = vadd.f32 %v1824_v41, %v1535_v63  ;;  %v3845_v59 = vld [vmem:[#allocation9 + $0x8c] ss:$16 sps:$4 sm:$0xff]   ;;  %v3840_v3 = vld [vmem:[#allocation9 + $0x2a8] ss:$16 sps:$4 sm:$0xff]  }
 0x223   :  { %v3843_v26 = vld [vmem:[#allocation9 + $0x88] ss:$16 sps:$4 sm:$0xff]   ;;  %v3851_v41 = vld [vmem:[#allocation9 + $0x6c] ss:$16 sps:$4 sm:$0xff]  }
 0x224   :  { %v1716_v6 = vadd.f32 %v1715_v47, %v1714_v40  ;;  %v1752_v55 = vrot.slane %v1751_v27, 4  ;;  %v1790_v60 = vadd.f32 %v1789_v39, %v1788_v45  ;;  %v1826_v46 = vrot.slane %v1825_v7, 4  ;;  %v3848_v40 = vld [vmem:[#allocation9 + $0x28c] ss:$16 sps:$4 sm:$0xff]   ;;  %v3846_v45 = vld [vmem:[#allocation9 + $0x288] ss:$16 sps:$4 sm:$0xff]  }
 0x225   :  { %v3854_v63 = vld [vmem:[#allocation9 + $0x26c] ss:$16 sps:$4 sm:$0xff]   ;;  %v3849_v47 = vld [vmem:[#allocation9 + $0x68] ss:$16 sps:$4 sm:$0xff]  }
 0x226   :  { %v1717_v30 = vrot.slane %v1716_v6, 2  ;;  %v1753_v2 = vadd.f32 %v1752_v55, %v1751_v27  ;;  %v1791_v51 = vrot.slane %v1790_v60, 2  ;;  %v1827_v9 = vadd.f32 %v1826_v46, %v1825_v7  ;;  %v3857_v27 = vld [vmem:[#allocation9 + $0x4c] ss:$16 sps:$4 sm:$0xff]   ;;  %v3852_v39 = vld [vmem:[#allocation9 + $0x268] ss:$16 sps:$4 sm:$0xff]  }
 0x227   :  { %v3860_v7 = vld [vmem:[#allocation9 + $0x24c] ss:$16 sps:$4 sm:$0xff]  }
 0x228   :  { %v1718_v12 = vadd.f32 %v1717_v30, %v1716_v6  ;;  %v1754_v31 = vrot.slane %v1753_v2, 2  ;;  %v1792_v20 = vadd.f32 %v1791_v51, %v1790_v60  ;;  %v1828_v34 = vrot.slane %v1827_v9, 2  ;;  %v3855_v6 = vld [vmem:[#allocation9 + $0x48] ss:$16 sps:$4 sm:$0xff]   ;;  %v3863_v55 = vld [vmem:[#allocation9 + $0x2c] ss:$16 sps:$4 sm:$0xff]  }
 0x229   :  { %v3858_v60 = vld [vmem:[#allocation9 + $0x248] ss:$16 sps:$4 sm:$0xff]   ;;  %v3866_v46 = vld [vmem:[#allocation9 + $0x22c] ss:$16 sps:$4 sm:$0xff]  }
 0x22a   :  { %v1719_v48 = vrot.slane %v1718_v12, 1  ;;  %v1755_v49 = vadd.f32 %v1754_v31, %v1753_v2  ;;  %v1793_v8 = vrot.slane %v1792_v20, 1  ;;  %v1829_v42 = vadd.f32 %v1828_v34, %v1827_v9  ;;  %v3861_v30 = vld [vmem:[#allocation9 + $0x28] ss:$16 sps:$4 sm:$0xff]   ;;  %v3869_v2 = vld [vmem:[#allocation9 + $0xc] ss:$16 sps:$4 sm:$0xff]  }
 0x22b   :  { %v3864_v51 = vld [vmem:[#allocation9 + $0x228] ss:$16 sps:$4 sm:$0xff]   ;;  %v3872_v9 = vld [vmem:[#allocation9 + $0x20c] ss:$16 sps:$4 sm:$0xff]  }
 0x22c   :  { %v1756_v44 = vrot.slane %v1755_v49, 1  ;;  %v1830_v19 = vrot.slane %v1829_v42, 1  ;;  %v1720_v11 = vadd.f32 %v1719_v48, %v1718_v12  ;;  %v1794_v43 = vadd.f32 %v1793_v8, %v1792_v20  ;;  %v3867_v12 = vld [vmem:[#allocation9 + $0x8] ss:$16 sps:$4 sm:$0xff]   ;;  %v3875_v31 = vld [vmem:[#allocation9 + $0x1ec] ss:$16 sps:$4 sm:$0xff]  }
 0x22d   :  { %v3870_v20 = vld [vmem:[#allocation9 + $0x208] ss:$16 sps:$4 sm:$0xff]   ;;  %v3878_v34 = vld [vmem:[#allocation9 + $0x3ec] ss:$16 sps:$4 sm:$0xff]  }
 0x22e   :  { %v1757_v21 = vadd.f32 %v1756_v44, %v1755_v49  ;;  %v1831_v32 = vadd.f32 %v1830_v19, %v1829_v42  ;;  %v3873_v48 = vld [vmem:[#allocation9 + $0x1e8] ss:$16 sps:$4 sm:$0xff]   ;;  %v3881_v49 = vld [vmem:[#allocation9 + $0x1cc] ss:$16 sps:$4 sm:$0xff]  }
 0x22f   :  { %v3876_v8 = vld [vmem:[#allocation9 + $0x3e8] ss:$16 sps:$4 sm:$0xff]   ;;  %v3884_v42 = vld [vmem:[#allocation9 + $0x3cc] ss:$16 sps:$4 sm:$0xff]  }
 0x230   :  { %v1864_v36 = vcombine.low %v1720_v11, %v1757_v21  ;;  %v1865_v25 = vcombine.low %v1794_v43, %v1831_v32  ;;  %v3879_v44 = vld [vmem:[#allocation9 + $0x1c8] ss:$16 sps:$4 sm:$0xff]   ;;  %v3887_v19 = vld [vmem:[#allocation9 + $0x1ac] ss:$16 sps:$4 sm:$0xff]  }
 0x231   :  { %v3882_v11 = vld [vmem:[#allocation9 + $0x3c8] ss:$16 sps:$4 sm:$0xff]   ;;  %v3890_v21 = vld [vmem:[#allocation9 + $0x3ac] ss:$16 sps:$4 sm:$0xff]  }
 0x232   :  { %v1872_v58 = vrot.slane %v1864_v36, %v4408_v4  ;;  %v1879_v10 = vrot.slane %v1865_v25, %v4408_v4  ;;  %v3885_v43 = vld [vmem:[#allocation9 + $0x1a8] ss:$16 sps:$4 sm:$0xff]   ;;  %v3893_v32 = vld [vmem:[#allocation9 + $0x18c] ss:$16 sps:$4 sm:$0xff]  }
 0x233   :  { %v3888_v36 = vld [vmem:[#allocation9 + $0x3a8] ss:$16 sps:$4 sm:$0xff]   ;;  %v3896_v25 = vld [vmem:[#allocation9 + $0x38c] ss:$16 sps:$4 sm:$0xff]  }
 0x234   :  { %v1880_v24 = vcombine.low %v1872_v58, %v1879_v10  ;;  %v3891_v58 = vld [vmem:[#allocation9 + $0x188] ss:$16 sps:$4 sm:$0xff]   ;;  %v3899_v10 = vld [vmem:[#allocation9 + $0x16c] ss:$16 sps:$4 sm:$0xff]  }
 0x236   :  { %v1885_v50 = vrot.slane %v1880_v24, 7  ;;  %v3894_v24 = vld [vmem:[#allocation9 + $0x388] ss:$16 sps:$4 sm:$0xff]  }
 0x238   :  { %v1887_v37 = vsel %vm1886_vm0, %v1885_v50, %v4819_v5  ;;  %v3897_v5 = vld [vmem:[#allocation9 + $0x168] ss:$16 sps:$4 sm:$0xff]  }
 0x239   :  { %v1889_v16 = vsel %vm1888_vm1, %v1885_v50, %v1887_v37  ;;  %v3905_v37 = vld [vmem:[#allocation9 + $0x14c] ss:$16 sps:$4 sm:$0xff]  }
 0x23a   :  { %v1891_v1 = vsel %vm1890_vm2, %v1885_v50, %v1889_v16  ;;  %v3900_v16 = vld [vmem:[#allocation9 + $0x368] ss:$16 sps:$4 sm:$0xff]  }
 0x23b   :  { %v1893_v52 = vsel %vm1892_vm3, %v1885_v50, %v1891_v1  ;;  %v3902_v50 = vld [vmem:[#allocation9 + $0x36c] ss:$16 sps:$4 sm:$0xff]  }
 0x23c   :  { %v1900_v53 = vmul.f32 0.00390625, %v1893_v52  ;;  %v3908_v1 = vld [vmem:[#allocation9 + $0x34c] ss:$16 sps:$4 sm:$0xff]   ;;  %v3903_v52 = vld [vmem:[#allocation9 + $0x148] ss:$16 sps:$4 sm:$0xff]  }
 0x23e   :  { %v1909_v14 = vrot.slane %v1900_v53, %v4408_v4  ;;  %v1902_v35 = vcombine.high %v1900_v53, %v1900_v53  ;;  %v3911_v53 = vld [vmem:[#allocation9 + $0x12c] ss:$16 sps:$4 sm:$0xff]  }
 0x240   :  { %v1917_v62 = vcombine.high %v1909_v14, %v1909_v14  ;;  %v1916_v54 = vrot.slane %v1902_v35, %v4408_v4  ;;  %v4753_v57 = vpack.c.bf16 %v1909_v14, %v1909_v14  ;;  %v3839_v4 = vld [vmem:[#allocation9 + $0xac] ss:$16 sps:$4 sm:$0xff]   ;;  %v3906_v14 = vld [vmem:[#allocation9 + $0x348] ss:$16 sps:$4 sm:$0xff]  }
 0x241   :  { %v3914_v35 = vld [vmem:[#allocation9 + $0x32c] ss:$16 sps:$4 sm:$0xff]  }
 0x242   :  { %v1924_v29 = vpack.c.bf16 %v1917_v62, %v1917_v62  ;;  %v1918_v38 = vcombine.high %v1916_v54, %v1916_v54  ;;  %v4756_v13 = vpack.c.bf16 %v1916_v54, %v1916_v54  ;;  %v3909_v62 = vld [vmem:[#allocation9 + $0x128] ss:$16 sps:$4 sm:$0xff]   ;;  %v3917_v54 = vld [vmem:[#allocation9 + $0x10c] ss:$16 sps:$4 sm:$0xff]  }
 0x244   :  { %2727 = vmatprep.mubr.bf16.mxu0 %v1924_v29  ;;  %v1926_v61 = vpack.c.bf16 %v1918_v38, %v1918_v38  ;;  %v3915_v38 = vld [vmem:[#allocation9 + $0x108] ss:$16 sps:$4 sm:$0xff]  }
 0x245   :  { %2728 = vmatmul.mubr.bf16.vlgmr.msra.gmra.mxu0 %v4753_v57 }
 0x246   :  { %2778 = vmatpush1.bf16.msra.mxu0 %v3825_v28  ;;  %2768 = vmatprep.mubr.bf16.mxu1 %v1926_v61  ;;  %v3920_v28 = vld [vmem:[#allocation9 + $0x30c] ss:$16 sps:$4 sm:$0xff]  }
 0x247   :  { %2809 = vmatprep.mubr.bf16.mxu0 %v1924_v29  ;;  %2769 = vmatmul.mubr.bf16.vlgmr.msra.gmra.mxu1 %v4756_v13  ;;  %v3912_v29 = vld [vmem:[#allocation9 + $0x328] ss:$16 sps:$4 sm:$0xff]  }
 0x248   :  { %2819 = vmatpush1.bf16.msra.mxu1 %v3828_v15  ;;  %2779 = vmatprep.subr.bf16.mxu0 %v3833_v22  ;;  %v3921_v15 = vld [vmem:[#allocation11 + $0x78] sm:$0xff]  }
 0x249   :  { %2850 = vmatprep.mubr.bf16.mxu1 %v1926_v61  ;;  %2820 = vmatprep.subr.bf16.mxu1 %v3836_v56  ;;  %v3918_v61 = vld [vmem:[#allocation9 + $0x308] ss:$16 sps:$4 sm:$0xff]   ;;  %v3923_v56 = vld [vmem:[#allocation11 + $0x70] sm:$0xff]  }
 0x24a   :  { %2780 = vmatpush1.bf16.msra.mxu0 %v3831_v18  ;;  %v3922_v22 = vld [vmem:[#allocation11 + $0x38] sm:$0xff]   ;;  %v3924_v18 = vld [vmem:[#allocation11 + $0x30] sm:$0xff]  }
 0x24b   :  { %2781 = vmatprep.subr.bf16.mxu0 %v3839_v4  ;;  %v3925_v4 = vld [vmem:[#allocation11 + $0x68] sm:$0xff]  }
 0x24c   :  { %2821 = vmatpush1.bf16.msra.mxu1 %v3834_v0  ;;  %v3926_v0 = vld [vmem:[#allocation11 + $0x28] sm:$0xff]  }
 0x24d   :  { %2822 = vmatprep.subr.bf16.mxu1 %v3842_v23  ;;  %v3927_v23 = vld [vmem:[#allocation11 + $0x60] sm:$0xff]  }
 0x24e   :  { %2782 = vmatpush1.bf16.msra.mxu0 %v3837_v33  ;;  %v3928_v33 = vld [vmem:[#allocation11 + $0x20] sm:$0xff]  }
 0x24f   :  { %2783 = vmatprep.subr.bf16.mxu0 %v3845_v59  ;;  %v3929_v59 = vld [vmem:[#allocation11 + $0x58] sm:$0xff]  }
 0x250   :  { %2823 = vmatpush1.bf16.msra.mxu1 %v3840_v3  ;;  %v3932_v3 = vld [vmem:[#allocation11 + $0x10] sm:$0xff]  }
 0x251   :  { %2824 = vmatprep.subr.bf16.mxu1 %v3848_v40  ;;  %v3933_v40 = vld [vmem:[#allocation11 + $0x48] sm:$0xff]  }
 0x252   :  { %2784 = vmatpush1.bf16.msra.mxu0 %v3843_v26  ;;  %v3934_v26 = vld [vmem:[#allocation11 + $0x8] sm:$0xff]  }
 0x253   :  { %2785 = vmatprep.subr.bf16.mxu0 %v3851_v41  ;;  %v3935_v41 = vld [vmem:[#allocation11 + $0x40] sm:$0xff]  }
 0x254   :  { %2825 = vmatpush1.bf16.msra.mxu1 %v3846_v45  ;;  %v3936_v45 = vld [vmem:[#allocation11] sm:$0xff]  }
 0x255   :  { %2826 = vmatprep.subr.bf16.mxu1 %v3854_v63  ;;  %v3937_v63 = vld [vmem:[#allocation11 + $0xf8] sm:$0xff]  }
 0x256   :  { %2786 = vmatpush1.bf16.msra.mxu0 %v3849_v47  ;;  %v3938_v47 = vld [vmem:[#allocation11 + $0xb8] sm:$0xff]  }
 0x257   :  { %2787 = vmatprep.subr.bf16.mxu0 %v3857_v27  ;;  %v3939_v27 = vld [vmem:[#allocation11 + $0xf0] sm:$0xff]  }
 0x258   :  { %2827 = vmatpush1.bf16.msra.mxu1 %v3852_v39  ;;  %v3940_v39 = vld [vmem:[#allocation11 + $0xb0] sm:$0xff]  }
 0x259   :  { %2828 = vmatprep.subr.bf16.mxu1 %v3860_v7  ;;  %v3941_v7 = vld [vmem:[#allocation11 + $0xe8] sm:$0xff]  }
 0x25a   :  { %2788 = vmatpush1.bf16.msra.mxu0 %v3855_v6  ;;  %v3942_v6 = vld [vmem:[#allocation11 + $0xa8] sm:$0xff]  }
 0x25b   :  { %2789 = vmatprep.subr.bf16.mxu0 %v3863_v55  ;;  %v3943_v55 = vld [vmem:[#allocation11 + $0xe0] sm:$0xff]  }
 0x25c   :  { %2829 = vmatpush1.bf16.msra.mxu1 %v3858_v60  ;;  %v3944_v60 = vld [vmem:[#allocation11 + $0xa0] sm:$0xff]  }
 0x25d   :  { %2830 = vmatprep.subr.bf16.mxu1 %v3866_v46  ;;  %v3945_v46 = vld [vmem:[#allocation11 + $0xd8] sm:$0xff]  }
 0x25e   :  { %2790 = vmatpush1.bf16.msra.mxu0 %v3861_v30  ;;  %v3946_v30 = vld [vmem:[#allocation11 + $0x98] sm:$0xff]  }
 0x25f   :  { %2791 = vmatprep.subr.bf16.mxu0 %v3869_v2  ;;  %v3947_v2 = vld [vmem:[#allocation11 + $0xd0] sm:$0xff]  }
 0x260   :  { %2831 = vmatpush1.bf16.msra.mxu1 %v3864_v51  ;;  %v3948_v51 = vld [vmem:[#allocation11 + $0x90] sm:$0xff]  }
 0x261   :  { %2832 = vmatprep.subr.bf16.mxu1 %v3872_v9  ;;  %v3949_v9 = vld [vmem:[#allocation11 + $0xc8] sm:$0xff]  }
 0x262   :  { %2792 = vmatpush1.bf16.msra.mxu0 %v3867_v12  ;;  %v3950_v12 = vld [vmem:[#allocation11 + $0x88] sm:$0xff]  }
 0x263   :  { %2793 = vmatprep.subr.bf16.mxu0 %v3875_v31  ;;  %v3951_v31 = vld [vmem:[#allocation11 + $0xc0] sm:$0xff]  }
 0x264   :  { %2833 = vmatpush1.bf16.msra.mxu1 %v3870_v20  ;;  %v3952_v20 = vld [vmem:[#allocation11 + $0x80] sm:$0xff]  }
 0x265   :  { %2834 = vmatprep.subr.bf16.mxu1 %v3878_v34 }
 0x266   :  { %2794 = vmatpush2.bf16.msra.mxu0 %v3873_v48 }
 0x267   :  { %2795 = vmatprep.subr.bf16.mxu0 %v3881_v49 }
 0x268   :  { %2835 = vmatpush2.bf16.msra.mxu1 %v3876_v8 }
 0x269   :  { %2836 = vmatprep.subr.bf16.mxu1 %v3884_v42 }
 0x26a   :  { %2796 = vmatpush2.bf16.msra.mxu0 %v3879_v44 }
 0x26b   :  { %2797 = vmatprep.subr.bf16.mxu0 %v3887_v19 }
 0x26c   :  { %2837 = vmatpush2.bf16.msra.mxu1 %v3882_v11 }
 0x26d   :  { %2838 = vmatprep.subr.bf16.mxu1 %v3890_v21 }
 0x26e   :  { %2798 = vmatpush2.bf16.msra.mxu0 %v3885_v43 }
 0x26f   :  { %2799 = vmatprep.subr.bf16.mxu0 %v3893_v32 }
 0x270   :  { %2839 = vmatpush2.bf16.msra.mxu1 %v3888_v36 }
 0x271   :  { %2840 = vmatprep.subr.bf16.mxu1 %v3896_v25 }
 0x272   :  { %2800 = vmatpush2.bf16.msra.mxu0 %v3891_v58 }
 0x273   :  { %2801 = vmatprep.subr.bf16.mxu0 %v3899_v10 }
 0x274   :  { %2841 = vmatpush2.bf16.msra.mxu1 %v3894_v24 }
 0x275   :  { %2842 = vmatprep.subr.bf16.mxu1 %v3902_v50 }
 0x276   :  { %2802 = vmatpush2.bf16.msra.mxu0 %v3897_v5 }
 0x277   :  { %2803 = vmatprep.subr.bf16.mxu0 %v3905_v37 }
 0x278   :  { %2843 = vmatpush2.bf16.msra.mxu1 %v3900_v16 }
 0x279   :  { %2844 = vmatprep.subr.bf16.mxu1 %v3908_v1 }
 0x27a   :  { %2804 = vmatpush2.bf16.msra.mxu0 %v3903_v52 }
 0x27b   :  { %2805 = vmatprep.subr.bf16.mxu0 %v3911_v53 }
 0x27c   :  { %2845 = vmatpush2.bf16.msra.mxu1 %v3906_v14 }
 0x27d   :  { %2846 = vmatprep.subr.bf16.mxu1 %v3914_v35 }
 0x27e   :  { %2806 = vmatpush2.bf16.msra.mxu0 %v3909_v62 }
 0x27f   :  { %2807 = vmatprep.subr.bf16.mxu0 %v3917_v54 }
 0x280   :  { %2847 = vmatpush2.bf16.msra.mxu1 %v3912_v29 }
 0x281   :  { %2848 = vmatprep.subr.bf16.mxu1 %v3920_v28 }
 0x282   :  { %2808 = vmatpush2.bf16.msra.mxu0 %v3915_v38 }
 0x283   :  { %3593 = vmatprep.subr.bf16.mxu0 %v3921_v15 }
 0x284   :  { %2849 = vmatpush2.bf16.msra.mxu1 %v3918_v61 }
 0x285   :  { %2810 = vmatmul.mubr.bf16.vlgmr.msra.gmra.mxu0 %v4753_v57  ;;  %v3930_v57 = vld [vmem:[#allocation11 + $0x18] sm:$0xff]   ;;  %3615 = vmatprep.subr.bf16.mxu1 %v3937_v63 }
 0x286   :  { %3594 = vmatpush3.bf16.msra.mxu0 %v3922_v22 }
 0x287   :  { %2851 = vmatmul.mubr.bf16.vlgmr.msra.gmra.mxu1 %v4756_v13  ;;  %3595 = vmatprep.subr.bf16.mxu0 %v3923_v56  ;;  %v3931_v13 = vld [vmem:[#allocation11 + $0x50] sm:$0xff]  }
 0x288   :  { %3616 = vmatpush3.bf16.msra.mxu1 %v3938_v47  ;;  %v4768_v47 = vld [vmem:[%s4805_s4] sm:$0xf] }
 0x289   :  { %3617 = vmatprep.subr.bf16.mxu1 %v3939_v27  ;;  %v4773_v27 = vld [vmem:[%s4806_s5] sm:$0xf] }
 0x28a   :  { %3596 = vmatpush3.bf16.msra.mxu0 %v3924_v18 }
 0x28b   :  { %3597 = vmatprep.subr.bf16.mxu0 %v3925_v4 }
 0x28c   :  { %3618 = vmatpush3.bf16.msra.mxu1 %v3940_v39  ;;  %v2950_v39 = vrot.slane %v4768_v47, %v4214_v17 }
 0x28d   :  { %3619 = vmatprep.subr.bf16.mxu1 %v3941_v7 }
 0x28e   :  { %3598 = vmatpush3.bf16.msra.mxu0 %v3926_v0 }
 0x28f   :  { %3599 = vmatprep.subr.bf16.mxu0 %v3927_v23 }
 0x290   :  { %3620 = vmatpush3.bf16.msra.mxu1 %v3942_v6 }
 0x291   :  { %3621 = vmatprep.subr.bf16.mxu1 %v3943_v55  ;;  %v2976_v55 = vrot.slane %v4773_v27, %v4214_v17 }
 0x292   :  { %3600 = vmatpush3.bf16.msra.mxu0 %v3928_v33 }
 0x293   :  { %3601 = vmatprep.subr.bf16.mxu0 %v3929_v59 }
 0x294   :  { %3622 = vmatpush3.bf16.msra.mxu1 %v3944_v60  ;;  %v4820_v60 = vld [vmem:[#allocation18_spill] sm:$0xff] }
 0x295   :  { %3623 = vmatprep.subr.bf16.mxu1 %v3945_v46  ;;  %v2954_v46 = vrot.slane %v4768_v47, %v4820_v60 }
 0x296   :  { %3602 = vmatpush3.bf16.msra.mxu0 %v3930_v57 }
 0x297   :  { %3603 = vmatprep.subr.bf16.mxu0 %v3931_v13 }
 0x298   :  { %3624 = vmatpush3.bf16.msra.mxu1 %v3946_v30 }
 0x299   :  { %3625 = vmatprep.subr.bf16.mxu1 %v3947_v2 }
 0x29a   :  { %3604 = vmatpush3.bf16.msra.mxu0 %v3932_v3 }
 0x29b   :  { %3605 = vmatprep.subr.bf16.mxu0 %v3933_v40 }
 0x29c   :  { %3626 = vmatpush3.bf16.msra.mxu1 %v3948_v51 }
 0x29d   :  { %3627 = vmatprep.subr.bf16.mxu1 %v3949_v9  ;;  %v2980_v9 = vrot.slane %v4773_v27, %v4820_v60 }
 0x29e   :  { %3606 = vmatpush3.bf16.msra.mxu0 %v3934_v26 }
 0x29f   :  { %3607 = vmatprep.subr.bf16.mxu0 %v3935_v41 }
 0x2a0   :  { %3628 = vmatpush3.bf16.msra.mxu1 %v3950_v12 }
 0x2a1   :  { %3629 = vmatprep.subr.bf16.mxu1 %v3951_v31 }
 0x2a2   :  { %3608 = vmatpush3.bf16.msra.mxu0 %v3936_v45 }
 0x2a4   :  { %3630 = vmatpush3.bf16.msra.mxu1 %v3952_v20 }
 0x305   :  { %v2729_v34 = vpop.f32.mrf.mxu0 }
 0x307   :  { %v2731_v48 = vpop.f32.mrf.mxu0  ;;  %v2770_v49 = vpop.f32.mrf.mxu1 }
 0x308   :  { %v2771_v8 = vadd.f32 %v2770_v49, %v2729_v34 }
 0x309   :  { %v2733_v42 = vpop.f32.mrf.mxu0  ;;  %v2772_v44 = vpop.f32.mrf.mxu1 }
 0x30a   :  { %v2860_v19 = vsel %vm2859_vm4, %v2771_v8, 0.0  ;;  %v2773_v11 = vadd.f32 %v2772_v44, %v2731_v48 }
 0x30b   :  { %v2861_v21 = vrot.slane %v2860_v19, 4  ;;  %v2734_v43 = vpop.f32.mrf.mxu0  ;;  %v2774_v32 = vpop.f32.mrf.mxu1 }
 0x30c   :  { %v2867_v36 = vsel %vm2859_vm4, %v2773_v11, 0.0 }
 0x30d   :  { %v2862_v25 = vadd.f32 %v2861_v21, %v2860_v19  ;;  %v2868_v58 = vrot.slane %v2867_v36, 4  ;;  %v2775_v10 = vpop.f32.mrf.mxu1 }
 0x30f   :  { %v2863_v24 = vrot.slane %v2862_v25, 2  ;;  %v2869_v50 = vadd.f32 %v2868_v58, %v2867_v36 }
 0x311   :  { %v2864_v5 = vadd.f32 %v2863_v24, %v2862_v25  ;;  %v2870_v37 = vrot.slane %v2869_v50, 2 }
 0x313   :  { %v2865_v16 = vrot.slane %v2864_v5, 1  ;;  %v2871_v1 = vadd.f32 %v2870_v37, %v2869_v50 }
 0x315   :  { %v2866_v52 = vadd.f32 %v2865_v16, %v2864_v5  ;;  %v2872_v53 = vrot.slane %v2871_v1, 1 }
 0x317   :  { %v2889_v14 = vmul.f32 0.5, %v2866_v52  ;;  %v2873_v35 = vadd.f32 %v2872_v53, %v2871_v1 }
 0x319   :  { %v2893_v62 = vsub.f32 %v2771_v8, %v2889_v14  ;;  %v2890_v54 = vmul.f32 0.5, %v2873_v35 }
 0x31b   :  { %v2897_v29 = vmul.f32 %v2893_v62, %v2893_v62  ;;  %v2894_v28 = vsub.f32 %v2773_v11, %v2890_v54 }
 0x31d   :  { %v2901_v38 = vsel %vm2859_vm4, %v2897_v29, 0.0  ;;  %v2898_v61 = vmul.f32 %v2894_v28, %v2894_v28 }
 0x31e   :  { %v2902_v15 = vrot.slane %v2901_v38, 4 }
 0x31f   :  { %v2908_v22 = vsel %vm2859_vm4, %v2898_v61, 0.0 }
 0x320   :  { %v2903_v56 = vadd.f32 %v2902_v15, %v2901_v38  ;;  %v2909_v18 = vrot.slane %v2908_v22, 4 }
 0x322   :  { %v2904_v4 = vrot.slane %v2903_v56, 2  ;;  %v2910_v0 = vadd.f32 %v2909_v18, %v2908_v22 }
 0x324   :  { %v2905_v23 = vadd.f32 %v2904_v4, %v2903_v56  ;;  %v2911_v33 = vrot.slane %v2910_v0, 2 }
 0x326   :  { %v2906_v59 = vrot.slane %v2905_v23, 1  ;;  %v2912_v57 = vadd.f32 %v2911_v33, %v2910_v0 }
 0x328   :  { %v2907_v13 = vadd.f32 %v2906_v59, %v2905_v23  ;;  %v2913_v3 = vrot.slane %v2912_v57, 1 }
 0x32a   :  { %v2929_v40 = vmul.f32 0.5, %v2907_v13  ;;  %v2914_v26 = vadd.f32 %v2913_v3, %v2912_v57 }
 0x32c   :  { %v2933_v41 = vadd.f32 1e-05, %v2929_v40  ;;  %v2930_v45 = vmul.f32 0.5, %v2914_v26 }
 0x32e   :  { %3953 = vrsqrt.f32 %v2933_v41  ;;  %v2934_v63 = vadd.f32 1e-05, %v2930_v45 }
 0x330   :  { %3955 = vrsqrt.f32 %v2934_v63 }
 0x33b   :  { %v3954_v7 = vpop.eup %3953 }
 0x33c   :  { %v2941_v6 = vmul.f32 %v3954_v7, %v2893_v62 }
 0x33d   :  { %v3956_v30 = vpop.eup %3955 }
 0x33e   :  { %v2967_v2 = vmul.f32 %v2950_v39, %v2941_v6  ;;  %v2942_v51 = vmul.f32 %v3956_v30, %v2894_v28 }
 0x340   :  { %v2993_v12 = vadd.f32 %v2976_v55, %v2967_v2  ;;  %v2968_v31 = vmul.f32 %v2954_v46, %v2942_v51  ;;  %v4821_v55 = vld [vmem:[#allocation17_spill] sm:$0xff]  ;;  %v4822_v51 = vld [vmem:[#allocation19_spill] sm:$0xff] }
 0x341   :  { %v2958_v60 = vrot.slane %v4768_v47, %v4821_v55  ;;  %v2984_v2 = vrot.slane %v4773_v27, %v4821_v55 }
 0x342   :  { %v2994_v20 = vadd.f32 %v2980_v9, %v2968_v31  ;;  %v2997_v34 = vmax.f32 %v2993_v12, 0.0  ;;  %v2962_v9 = vrot.slane %v4768_v47, %v4822_v51 }
 0x344   :  { %v2998_v48 = vmax.f32 %v2994_v20, 0.0  ;;  %v3001_v42 = vpack.c.bf16 %v2997_v34, %v2997_v34  ;;  %v2988_v34 = vrot.slane %v4773_v27, %v4822_v51 }
 0x345   :  { %v2811_v49 = vpop.f32.mrf.mxu0 }
 0x346   :  { %v3002_v8 = vpack.c.bf16 %v2998_v48, %v2998_v48 }
 0x347   :  { %v2813_v44 = vpop.f32.mrf.mxu0  ;;  %v2852_v19 = vpop.f32.mrf.mxu1 }
 0x348   :  { %v2853_v17 = vadd.f32 %v2852_v19, %v2811_v49  ;;  %3300 = vmatprep.mubr.bf16.mxu0 %v3002_v8 }
 0x349   :  { %v2815_v11 = vpop.f32.mrf.mxu0  ;;  %v2854_v21 = vpop.f32.mrf.mxu1  ;;  %3301 = vmatmul.mubr.bf16.vlgmr.msra.gmra.mxu0 %v3001_v42 }
 0x34a   :  { %v2874_v43 = vsel %vm2859_vm4, %v2853_v17, 0.0  ;;  %v2855_v32 = vadd.f32 %v2854_v21, %v2813_v44 }
 0x34b   :  { %v2875_v36 = vrot.slane %v2874_v43, 4  ;;  %v2816_v25 = vpop.f32.mrf.mxu0  ;;  %v2856_v58 = vpop.f32.mrf.mxu1 }
 0x34c   :  { %v2881_v10 = vsel %vm2859_vm4, %v2855_v32, 0.0 }
 0x34d   :  { %v2876_v24 = vadd.f32 %v2875_v36, %v2874_v43  ;;  %v2882_v50 = vrot.slane %v2881_v10, 4  ;;  %v2857_v5 = vpop.f32.mrf.mxu1  ;;  %v3560_v36 = vld [vmem:[%s4808_s7] ss:$0 sm:$0xff] }
 0x34f   :  { %v2877_v37 = vrot.slane %v2876_v24, 2  ;;  %v2883_v16 = vadd.f32 %v2882_v50, %v2881_v10 }
 0x351   :  { %v2878_v1 = vadd.f32 %v2877_v37, %v2876_v24  ;;  %v2884_v52 = vrot.slane %v2883_v16, 2 }
 0x353   :  { %v2879_v53 = vrot.slane %v2878_v1, 1  ;;  %v2885_v14 = vadd.f32 %v2884_v52, %v2883_v16 }
 0x355   :  { %v2880_v35 = vadd.f32 %v2879_v53, %v2878_v1  ;;  %v2886_v62 = vrot.slane %v2885_v14, 1 }
 0x357   :  { %v2891_v54 = vmul.f32 0.5, %v2880_v35  ;;  %v2887_v29 = vadd.f32 %v2886_v62, %v2885_v14 }
 0x359   :  { %v2895_v28 = vsub.f32 %v2853_v17, %v2891_v54  ;;  %v2892_v38 = vmul.f32 0.5, %v2887_v29 }
 0x35b   :  { %v2899_v61 = vmul.f32 %v2895_v28, %v2895_v28  ;;  %v2896_v15 = vsub.f32 %v2855_v32, %v2892_v38 }
 0x35d   :  { %v2915_v22 = vsel %vm2859_vm4, %v2899_v61, 0.0  ;;  %v2900_v56 = vmul.f32 %v2896_v15, %v2896_v15 }
 0x35e   :  { %v2916_v18 = vrot.slane %v2915_v22, 4 }
 0x35f   :  { %v2922_v4 = vsel %vm2859_vm4, %v2900_v56, 0.0 }
 0x360   :  { %v2917_v0 = vadd.f32 %v2916_v18, %v2915_v22  ;;  %v2923_v23 = vrot.slane %v2922_v4, 4 }
 0x362   :  { %v2918_v33 = vrot.slane %v2917_v0, 2  ;;  %v2924_v59 = vadd.f32 %v2923_v23, %v2922_v4 }
 0x364   :  { %v2919_v57 = vadd.f32 %v2918_v33, %v2917_v0  ;;  %v2925_v13 = vrot.slane %v2924_v59, 2 }
 0x366   :  { %v2920_v3 = vrot.slane %v2919_v57, 1  ;;  %v2926_v40 = vadd.f32 %v2925_v13, %v2924_v59 }
 0x368   :  { %v2921_v26 = vadd.f32 %v2920_v3, %v2919_v57  ;;  %v2927_v41 = vrot.slane %v2926_v40, 1 }
 0x36a   :  { %v2931_v45 = vmul.f32 0.5, %v2921_v26  ;;  %v2928_v63 = vadd.f32 %v2927_v41, %v2926_v40 }
 0x36c   :  { %v2935_v39 = vadd.f32 1e-05, %v2931_v45  ;;  %v2932_v7 = vmul.f32 0.5, %v2928_v63 }
 0x36e   :  { %3957 = vrsqrt.f32 %v2935_v39  ;;  %v2936_v6 = vadd.f32 1e-05, %v2932_v7 }
 0x370   :  { %3959 = vrsqrt.f32 %v2936_v6 }
 0x37b   :  { %v3958_v46 = vpop.eup %3957 }
 0x37c   :  { %v2943_v30 = vmul.f32 %v3958_v46, %v2895_v28 }
 0x37d   :  { %v3960_v12 = vpop.eup %3959 }
 0x37e   :  { %v2969_v31 = vmul.f32 %v2958_v60, %v2943_v30  ;;  %v2944_v20 = vmul.f32 %v3960_v12, %v2896_v15 }
 0x380   :  { %v2995_v48 = vadd.f32 %v2984_v2, %v2969_v31  ;;  %v2970_v49 = vmul.f32 %v2962_v9, %v2944_v20 }
 0x382   :  { %v2996_v8 = vadd.f32 %v2988_v34, %v2970_v49  ;;  %v2999_v42 = vmax.f32 %v2995_v48, 0.0 }
 0x384   :  { %v3000_v44 = vmax.f32 %v2996_v8, 0.0  ;;  %v3003_v17 = vpack.c.bf16 %v2999_v42, %v2999_v42 }
 0x386   :  { %v3004_v19 = vpack.c.bf16 %v3000_v44, %v3000_v44 }
 0x388   :  { %3340 = vmatprep.mubr.bf16.mxu1 %v3004_v19 }
 0x389   :  { %3341 = vmatmul.mubr.bf16.vlgmr.msra.gmra.mxu1 %v3003_v17 }
 0x409   :  { %v3609_v11 = vpop.f32.mrf.mxu0 }
 0x40b   :  { %v3610_v21 = vpop.f32.mrf.mxu0 }
 0x40c   :  { %v3611_v47 = vadd.f32 %v3610_v21, %v3609_v11 }
 0x40d   :  { %v3612_v43 = vpop.f32.mrf.mxu0 }
 0x40e   :  { %v3303_v58 = vadd.f32 %v3611_v47, %v3560_v36 }
 0x40f   :  { %v3613_v32 = vpop.f32.mrf.mxu0 }
 0x449   :  { %v3631_v25 = vpop.f32.mrf.mxu1 }
 0x44b   :  { %v3632_v27 = vpop.f32.mrf.mxu1 }
 0x44c   :  { %v3633_v10 = vadd.f32 %v3632_v27, %v3631_v25 }
 0x44d   :  { %v3634_v24 = vpop.f32.mrf.mxu1 }
 0x44e   :  { %v3343_v50 = vadd.f32 %v3633_v10, %v3303_v58 }
 0x44f   :  { %v3635_v5 = vpop.f32.mrf.mxu1 }
 0x450   :  { %3348 = vst [vmem:[#allocation12] sm:$0x3] %v3343_v50 }
 0x451   :  { %4072 = shalt.err (!%p4069_p1)
}
 0x452   :  { %3358 = dma.vmem_to_hbm [thread:$0]  %s3356_s12, 32, %s4809_s8, [#allocation5]  }
 0x453   :  { %4087 = dma.done.wait [#allocation5], 32  }
 0x454   :  { %4088 = vsyncadd [#allocation5], 4294967264 }
 0x455   :  { %3362 = vsyncpa [#allocation4], 1 }
 0x456   :  { %3363 = vsyncpa [#allocation7], 1 }
 0x457   :  { %3364 = vsyncpa [#allocation10], 1 }
 0x458   :  { %3365 = vsyncpa [#allocation5], 1 }

</bundles_post_ra>
